<compile_context>
chip_gen: v5e
topology: v5e:2x2
jax: 0.10.0
libtpu: 0.0.40
codegen_flags: <defaults>
</compile_context>

<pallas_src>
import jax
import jax.numpy as jnp
from jax.experimental import pallas as pl
from jax.experimental.pallas import tpu as pltpu


def _leaky_relu(v, slope=0.2):
    return jnp.where(v > 0, v, slope * v)


def _round_up(a, b):
    return (a + b - 1) // b * b


# --------------------------------------------------------------------------- #
# Kernels
# --------------------------------------------------------------------------- #
def _fused_kernel(a_ref, invdeg_ref, xwl1_ref, xwr1b_ref, p_ref,
                  wl2_ref, wr2_ref, bl2_ref, w1_ref, b1_ref, w2_ref, b2_ref,
                  out_ref):
    """A resident in VMEM (read from HBM once): conv1 + conv2 + pool + MLP."""
    f32, bf16 = jnp.float32, jnp.bfloat16
    a = a_ref[...]                                   # (Np, Np) bf16 counts
    inv = invdeg_ref[...]                            # (Np, 1)  f32 exact 1/deg
    agg1 = jnp.dot(a, xwl1_ref[...], preferred_element_type=f32) * inv
    h1 = _leaky_relu(agg1 + xwr1b_ref[...])          # (Np, 32) f32
    h1_bf = h1.astype(bf16)
    h1l = jnp.dot(h1_bf, wl2_ref[...], preferred_element_type=f32).astype(bf16)
    h1r = jnp.dot(h1_bf, wr2_ref[...], preferred_element_type=f32) + bl2_ref[...]
    agg2 = jnp.dot(a, h1l, preferred_element_type=f32) * inv
    h2 = _leaky_relu(agg2 + h1r)                     # (Np, 8)  f32
    pooled = jnp.dot(p_ref[...], h2, preferred_element_type=f32)   # (G, 8)
    z = _leaky_relu(jnp.dot(pooled, w1_ref[...], preferred_element_type=f32)
                    + b1_ref[...])
    # dropout(p=0.5) is identity in eval mode
    out_ref[...] = (jnp.dot(z, w2_ref[...], preferred_element_type=f32)
                    + b2_ref[...]).astype(out_ref.dtype)


def _conv1_kernel(a_ref, xwl_ref, xwr_ref, invdeg_ref,
                  wl2_ref, wr2_ref, bl2_ref, h1l_ref, h1r_ref):
    """Streamed pass 1: SAGEConv1 on one row tile; emit h1@Wl2 / h1@Wr2+b."""
    f32, bf16 = jnp.float32, jnp.bfloat16
    a_bf = a_ref[...].astype(f32).astype(bf16)       # int8 counts -> bf16 (exact)
    agg = jnp.dot(a_bf, xwl_ref[...], preferred_element_type=f32)   # (T, 32)
    h1 = _leaky_relu(agg * invdeg_ref[...] + xwr_ref[...])          # (T, 32) f32
    h1_bf = h1.astype(bf16)
    h1l_ref[...] = jnp.dot(h1_bf, wl2_ref[...],
                           preferred_element_type=f32).astype(h1l_ref.dtype)
    h1r_ref[...] = (jnp.dot(h1_bf, wr2_ref[...], preferred_element_type=f32)
                    + bl2_ref[...]).astype(h1r_ref.dtype)


def _conv2_pool_kernel(a_ref, h1l_ref, h1r_ref, invdeg_ref, p_ref, part_ref):
    """Streamed pass 2: SAGEConv2 on one row tile + per-tile partial pool."""
    f32, bf16 = jnp.float32, jnp.bfloat16
    a_bf = a_ref[...].astype(f32).astype(bf16)
    agg = jnp.dot(a_bf, h1l_ref[...], preferred_element_type=f32)   # (T, 8)
    h2 = _leaky_relu(agg * invdeg_ref[...] + h1r_ref[...])          # (T, 8) f32
    # partial global_add_pool of this row tile (padded nodes: zero P columns)
    part_ref[...] = jnp.dot(p_ref[...], h2, preferred_element_type=f32)


def _tail_kernel(part_ref, w1_ref, b1_ref, w2_ref, b2_ref, out_ref):
    """Reduce per-tile partial pools and run the lin1 -> lin2 head."""
    f32 = jnp.float32
    pooled = jnp.sum(part_ref[...], axis=0)                         # (G, 8)
    z = _leaky_relu(jnp.dot(pooled, w1_ref[...], preferred_element_type=f32)
                    + b1_ref[...])
    out_ref[...] = (jnp.dot(z, w2_ref[...], preferred_element_type=f32)
                    + b2_ref[...]).astype(out_ref.dtype)


# --------------------------------------------------------------------------- #
# Operator construction (XLA, outside the kernels)
# --------------------------------------------------------------------------- #
def _device_defaults():
    """(default tile_n, vmem limit bytes) per TPU generation."""
    kind = ""
    try:
        kind = jax.devices()[0].device_kind.lower()
    except Exception:
        pass
    if "v7" in kind or "tpu7" in kind or "7x" in kind:
        return 256, 48 << 20           # v7x: 64 MiB/TC physical, leave headroom
    if "v6" in kind or "v5" in kind or "v4" in kind:
        return 512, 96 << 20           # 128 MiB physical, raised scoped limit
    return 256, 32 << 20               # unknown: conservative


def _build_dense_operators(x, edge_index, batch, num_graphs, n_pad, a_dtype):
    """Un-normalized adjacency counts, exact 1/deg, pooling matrix, padded x."""
    N, F_in = x.shape
    src = edge_index[0].astype(jnp.int32)
    dst = edge_index[1].astype(jnp.int32)
    # in-degree; duplicate edges count multiple times (matches PyG scatter-mean)
    deg = jnp.zeros((n_pad,), jnp.float32).at[dst].add(1.0)
    inv_deg = (1.0 / jnp.maximum(deg, 1.0)).reshape(n_pad, 1)        # exact f32
    # compressed un-normalized adjacency counts (0/1/.. exact in int8 and bf16)
    # TODO(synk): int8 saturates above 127 parallel edges between one node pair.
    A = jnp.zeros((n_pad, n_pad), a_dtype).at[dst, src].add(
        jnp.ones(dst.shape, a_dtype))
    # pooling matrix; padded nodes get graph id -1 -> zero column
    batch_p = jnp.full((n_pad,), -1, jnp.int32).at[:N].set(batch.astype(jnp.int32))
    P = (batch_p[None, :] == jnp.arange(num_graphs, dtype=jnp.int32)[:, None]
         ).astype(jnp.float32)
    x_p = jnp.zeros((n_pad, F_in), jnp.float32).at[:N, :].set(x.astype(jnp.float32))
    return A, inv_deg, P, x_p


def _project_inputs(x_p, params, n_valid):
    """Pre-projected conv1 operands: x@Wl1 (bf16) and x@Wr1 + b (f32, masked)."""
    f32, bf16 = jnp.float32, jnp.bfloat16
    n_pad = x_p.shape[0]
    xwl1 = jnp.dot(x_p, params["wl1"].astype(f32)).astype(bf16)      # (Np, 32)
    mask = (jnp.arange(n_pad) < n_valid)[:, None]
    xwr1b = jnp.where(mask,
                      jnp.dot(x_p, params["wr1"].astype(f32))
                      + params["bl1"].astype(f32),
                      0.0).astype(f32)                               # (Np, 32)
    return xwl1, xwr1b


# --------------------------------------------------------------------------- #
# Forward wrapper
# --------------------------------------------------------------------------- #
def sage_forward(x, edge_index, batch, params, num_graphs, *,
                 tile_n=None, force_streamed=False):
    f32, bf16 = jnp.float32, jnp.bfloat16
    N, _ = x.shape
    G = int(num_graphs)

    tile_default, vmem_cap = _device_defaults()
    if tile_n is None:
        tile_n = tile_default
    tile_n = max(128, _round_up(int(tile_n), 128))

    wl2_bf = params["wl2"].astype(bf16)
    wr2_bf = params["wr2"].astype(bf16)
    bl2 = params["bl2"].astype(f32)
    w1, b1 = params["w1"].astype(f32), params["b1"].astype(f32)
    w2, b2 = params["w2"].astype(f32), params["b2"].astype(f32)

    # ----------------- fused path: A resident in VMEM, one HBM read ----------
    n_pad_f = _round_up(max(N, 128), 128)
    fused_bytes = (2 * n_pad_f * n_pad_f                  # bf16 A, resident
                   + n_pad_f * 128 * (2 + 4 + 4 + 4)      # xwl1/xwr1b/h1/agg (lane-padded)
                   + _round_up(G, 8) * n_pad_f * 4        # P
                   + (4 << 20))                           # headroom
    if (not force_streamed) and fused_bytes <= int(0.55 * vmem_cap):
        A, inv_deg, P, x_p = _build_dense_operators(
            x, edge_index, batch, G, n_pad_f, bf16)
        xwl1, xwr1b = _project_inputs(x_p, params, N)
        out = pl.pallas_call(
            _fused_kernel,
            out_shape=jax.ShapeDtypeStruct((G, 2), f32),
            compiler_params=pltpu.CompilerParams(
                vmem_limit_bytes=int(vmem_cap)),
        )(A, inv_deg, xwl1, xwr1b, P, wl2_bf, wr2_bf, bl2, w1, b1, w2, b2)
        return out, None  # TODO(synk): selected_nodes undefined when prune=False

    # ----------------- streamed path: int8 A row tiles, two parallel passes --
    def _tile_bytes(t):
        npd = _round_up(max(N, t), t)
        return (2 * t * npd            # int8 A tile, double-buffered
                + t * npd * 2          # in-kernel bf16 upcast of the tile
                + npd * 128 * 2        # resident x@Wl1 (lane-padded)
                + 8 * t * 128 * 4      # small tiled streams (xwr/invdeg/P/outs)
                + (2 << 20))
    while tile_n > 128 and _tile_bytes(tile_n) > int(0.7 * vmem_cap):
        tile_n //= 2
    tile_n = max(128, tile_n)

    n_pad = _round_up(max(N, tile_n), tile_n)
    n_tiles = n_pad // tile_n
    vmem_limit = int(vmem_cap)

    A, inv_deg, P, x_p = _build_dense_operators(
        x, edge_index, batch, G, n_pad, jnp.int8)
    xwl1, xwr1b = _project_inputs(x_p, params, N)

    # pass 1: conv1 per row tile -> h1@Wl2 (bf16) and h1@Wr2+b (f32)
    cost1 = pl.CostEstimate(
        flops=int(2 * n_pad * n_pad * 32 + 2 * 2 * n_pad * 32 * 8),
        transcendentals=0,
        bytes_accessed=int(n_pad * n_pad
                           + n_pad * (32 * 2 + 32 * 4 + 4 + 8 * 2 + 8 * 4)))
    h1l, h1r = pl.pallas_call(
        _conv1_kernel,
        out_shape=(jax.ShapeDtypeStruct((n_pad, 8), bf16),
                   jax.ShapeDtypeStruct((n_pad, 8), f32)),
        grid_spec=pltpu.PrefetchScalarGridSpec(
            num_scalar_prefetch=0,
            grid=(n_tiles,),
            in_specs=[
                pl.BlockSpec((tile_n, n_pad), lambda i: (i, 0)),   # A int8 stream
                pl.BlockSpec((n_pad, 32), lambda i: (0, 0)),       # x@Wl1 resident
                pl.BlockSpec((tile_n, 32), lambda i: (i, 0)),      # x@Wr1+b tile
                pl.BlockSpec((tile_n, 1), lambda i: (i, 0)),       # 1/deg tile
                pl.BlockSpec((32, 8), lambda i: (0, 0)),           # Wl2
                pl.BlockSpec((32, 8), lambda i: (0, 0)),           # Wr2
                pl.BlockSpec((1, 8), lambda i: (0, 0)),            # bl2
            ],
            out_specs=[pl.BlockSpec((tile_n, 8), lambda i: (i, 0)),
                       pl.BlockSpec((tile_n, 8), lambda i: (i, 0))],
        ),
        compiler_params=pltpu.CompilerParams(
            dimension_semantics=("parallel",),
            vmem_limit_bytes=vmem_limit),
        cost_estimate=cost1,
    )(A, xwl1, xwr1b, inv_deg, wl2_bf, wr2_bf, bl2)

    # pass 2: conv2 per row tile + per-tile partial pooled sums (no serializing
    # accumulator -> both TensorCores usable on v7x)
    cost2 = pl.CostEstimate(
        flops=int(2 * n_pad * n_pad * 8 + 2 * G * n_pad * 8),
        transcendentals=0,
        bytes_accessed=int(n_pad * n_pad + n_pad * (8 * 2 + 8 * 4 + 4)
                           + G * n_pad * 4 + n_tiles * G * 8 * 4))
    partials = pl.pallas_call(
        _conv2_pool_kernel,
        out_shape=jax.ShapeDtypeStruct((n_tiles, G, 8), f32),
        grid_spec=pltpu.PrefetchScalarGridSpec(
            num_scalar_prefetch=0,
            grid=(n_tiles,),
            in_specs=[
                pl.BlockSpec((tile_n, n_pad), lambda i: (i, 0)),   # A int8 stream
                pl.BlockSpec((n_pad, 8), lambda i: (0, 0)),        # h1@Wl2 resident
                pl.BlockSpec((tile_n, 8), lambda i: (i, 0)),       # h1@Wr2+b tile
                pl.BlockSpec((tile_n, 1), lambda i: (i, 0)),       # 1/deg tile
                pl.BlockSpec((G, tile_n), lambda i: (0, i)),       # pooling columns
            ],
            out_specs=pl.BlockSpec((None, G, 8), lambda i: (i, 0, 0)),
        ),
        compiler_params=pltpu.CompilerParams(
            dimension_semantics=("parallel",),
            vmem_limit_bytes=vmem_limit),
        cost_estimate=cost2,
    )(A, h1l, h1r, inv_deg, P)

    # tiny tail: reduce partial pools + lin1/lin2 head
    out = pl.pallas_call(
        _tail_kernel,
        out_shape=jax.ShapeDtypeStruct((G, 2), f32),
    )(partials, w1, b1, w2, b2)

    return out, None  # TODO(synk): selected_nodes undefined when prune=False


# --------------------------------------------------------------------------- #
# Parameters & references
# --------------------------------------------------------------------------- #
def init_params(key, input_dim):
    """Deterministic synthetic init; weights are (in, out) = W^T of torch Linear."""
    ks = jax.random.split(key, 10)
    s = 0.1
    return {
        "wl1": jax.random.normal(ks[0], (input_dim, 32), jnp.float32) * s,
        "bl1": jax.random.normal(ks[1], (1, 32), jnp.float32) * s,
        "wr1": jax.random.normal(ks[2], (input_dim, 32), jnp.float32) * s,
        "wl2": jax.random.normal(ks[3], (32, 8), jnp.float32) * s,
        "bl2": jax.random.normal(ks[4], (1, 8), jnp.float32) * s,
        "wr2": jax.random.normal(ks[5], (32, 8), jnp.float32) * s,
        "w1":  jax.random.normal(ks[6], (8, 8), jnp.float32) * s,
        "b1":  jax.random.normal(ks[7], (1, 8), jnp.float32) * s,
        "w2":  jax.random.normal(ks[8], (8, 2), jnp.float32) * s,
        "b2":  jax.random.normal(ks[9], (1, 2), jnp.float32) * s,
    }


def _forward_from_operators(A, inv_deg, xwl1_bf, xwr1b, P, params):
    """Pure-JAX mirror of the kernel math (same dtype boundaries)."""
    f32, bf16 = jnp.float32, jnp.bfloat16
    a_bf = A.astype(f32).astype(bf16)
    agg1 = jnp.dot(a_bf, xwl1_bf, preferred_element_type=f32) * inv_deg
    h1 = _leaky_relu(agg1 + xwr1b)
    h1_bf = h1.astype(bf16)
    h1l = jnp.dot(h1_bf, params["wl2"].astype(bf16),
                  preferred_element_type=f32).astype(bf16)
    h1r = jnp.dot(h1_bf, params["wr2"].astype(bf16),
                  preferred_element_type=f32) + params["bl2"].astype(f32)
    agg2 = jnp.dot(a_bf, h1l, preferred_element_type=f32) * inv_deg
    h2 = _leaky_relu(agg2 + h1r)
    pooled = jnp.dot(P, h2, preferred_element_type=f32)
    z = _leaky_relu(pooled @ params["w1"].astype(f32) + params["b1"].astype(f32))
    return z @ params["w2"].astype(f32) + params["b2"].astype(f32)


def reference_like_for_like(x, edge_index, batch, params, num_graphs):
    N = x.shape[0]
    n_pad = _round_up(max(N, 128), 128)
    A, inv_deg, P, x_p = _build_dense_operators(
        x, edge_index, batch, num_graphs, n_pad, jnp.bfloat16)
    xwl1, xwr1b = _project_inputs(x_p, params, N)
    return _forward_from_operators(A, inv_deg, xwl1, xwr1b, P, params)


def reference_f32(x, edge_index, batch, params, num_graphs):
    """Fully-f32 reference (same math, no padding / compression)."""
    N = x.shape[0]
    src, dst = edge_index[0], edge_index[1]
    counts = jnp.zeros((N, N), jnp.float32).at[dst, src].add(1.0)
    A = counts / jnp.maximum(counts.sum(axis=1, keepdims=True), 1.0)
    P = jax.nn.one_hot(batch, num_graphs, dtype=jnp.float32).T
    h1 = _leaky_relu(A @ x @ params["wl1"] + params["bl1"] + x @ params["wr1"])
    h2 = _leaky_relu(A @ h1 @ params["wl2"] + params["bl2"] + h1 @ params["wr2"])
    pooled = P @ h2
    z = _leaky_relu(pooled @ params["w1"] + params["b1"])
    return z @ params["w2"] + params["b2"]


if __name__ == "__main__":
    key = jax.random.PRNGKey(0)
    k_x, k_p = jax.random.split(key)

    # synthetic batch: 2 ring graphs of 80 nodes each, input_dim = 16
    nodes_per_graph, num_graphs, input_dim = 80, 2, 16
    N = nodes_per_graph * num_graphs
    x = jax.random.normal(k_x, (N, input_dim), jnp.float32)

    src_list, dst_list = [], []
    for g in range(num_graphs):
        base = g * nodes_per_graph
        for i in range(nodes_per_graph):
            j = (i + 1) % nodes_per_graph
            src_list += [base + i, base + j]
            dst_list += [base + j, base + i]
    edge_index = jnp.array([src_list, dst_list], dtype=jnp.int32)
    batch = jnp.repeat(jnp.arange(num_graphs, dtype=jnp.int32), nodes_per_graph)

    params = init_params(k_p, input_dim)

    # path 1: fused kernel (A resident in VMEM, single pallas_call)
    out_fused, sel = sage_forward(x, edge_index, batch, params, num_graphs)
    out_fused = jax.block_until_ready(out_fused)
    assert out_fused.shape == (num_graphs, 2)

    # path 2: streamed two-pass kernels (tile_n=128 -> padded N=256, 2 tiles,
    # exercises the int8 streaming + partial-pool + tail pipeline)
    out_stream, _ = sage_forward(x, edge_index, batch, params, num_graphs,
                                 tile_n=128, force_streamed=True)
    out_stream = jax.block_until_ready(out_stream)
    assert out_stream.shape == (num_graphs, 2)

    ref_ll = reference_like_for_like(x, edge_index, batch, params, num_graphs)
    ref_f = reference_f32(x, edge_index, batch, params, num_graphs)

    assert jnp.allclose(out_fused, ref_ll, atol=5e-3, rtol=5e-3), (out_fused, ref_ll)
    assert jnp.allclose(out_stream, ref_ll, atol=5e-3, rtol=5e-3), (out_stream, ref_ll)
    assert jnp.allclose(out_fused, ref_f, atol=5e-2, rtol=5e-2), (out_fused, ref_f)
    assert jnp.allclose(out_stream, ref_f, atol=5e-2, rtol=5e-2), (out_stream, ref_f)
    print("KERNEL_OK")
</pallas_src>

<mosaic_0001>
module attributes {stable_mosaic.version = 11 : i64} {
  func.func @_fused_kernel(%arg0: memref<256x256xbf16, #tpu.memory_space<vmem>>, %arg1: memref<256x1xf32, #tpu.memory_space<vmem>>, %arg2: memref<256x32xbf16, #tpu.memory_space<vmem>>, %arg3: memref<256x32xf32, #tpu.memory_space<vmem>>, %arg4: memref<2x256xf32, #tpu.memory_space<vmem>>, %arg5: memref<32x8xbf16, #tpu.memory_space<vmem>>, %arg6: memref<32x8xbf16, #tpu.memory_space<vmem>>, %arg7: memref<1x8xf32, #tpu.memory_space<vmem>>, %arg8: memref<8x8xf32, #tpu.memory_space<vmem>>, %arg9: memref<1x8xf32, #tpu.memory_space<vmem>>, %arg10: memref<8x2xf32, #tpu.memory_space<vmem>>, %arg11: memref<1x2xf32, #tpu.memory_space<vmem>>, %arg12: memref<2x2xf32, #tpu.memory_space<vmem>>) attributes {dimension_semantics = [], scalar_prefetch = 0 : i64, scratch_operands = 0 : i64, tpu.core_type = #tpu.core_type<tc>} {
    %c0 = arith.constant 0 : index
    %c0_0 = arith.constant 0 : index
    %0 = vector.load %arg0[%c0, %c0_0] : memref<256x256xbf16, #tpu.memory_space<vmem>>, vector<256x256xbf16>
    %c0_1 = arith.constant 0 : index
    %c0_2 = arith.constant 0 : index
    %1 = vector.load %arg1[%c0_1, %c0_2] : memref<256x1xf32, #tpu.memory_space<vmem>>, vector<256x1xf32>
    %c0_3 = arith.constant 0 : index
    %c0_4 = arith.constant 0 : index
    %2 = vector.load %arg2[%c0_3, %c0_4] : memref<256x32xbf16, #tpu.memory_space<vmem>>, vector<256x32xbf16>
    %cst = arith.constant dense<0.000000e+00> : vector<256x32xf32>
    %3 = tpu.matmul %0, %2, %cst {dimension_numbers = #tpu.dot_dimension_numbers<[1], [0], [0], [1], [0, 0, 1, 1], [], []>} : vector<256x256xbf16>, vector<256x32xbf16>, vector<256x32xf32> -> vector<256x32xf32>
    %4 = vector.broadcast %1 : vector<256x1xf32> to vector<256x32xf32>
    %5 = arith.mulf %3, %4 : vector<256x32xf32>
    %c0_5 = arith.constant 0 : index
    %c0_6 = arith.constant 0 : index
    %6 = vector.load %arg3[%c0_5, %c0_6] : memref<256x32xf32, #tpu.memory_space<vmem>>, vector<256x32xf32>
    %7 = arith.addf %5, %6 : vector<256x32xf32>
    %cst_7 = arith.constant 0.000000e+00 : f32
    %8 = vector.broadcast %cst_7 : f32 to vector<256x32xf32>
    %9 = arith.cmpf ogt, %7, %8 : vector<256x32xf32>
    %cst_8 = arith.constant 2.000000e-01 : f32
    %10 = vector.broadcast %cst_8 : f32 to vector<256x32xf32>
    %11 = arith.mulf %10, %7 : vector<256x32xf32>
    %12 = arith.select %9, %7, %11 : vector<256x32xi1>, vector<256x32xf32>
    %13 = arith.truncf %12 : vector<256x32xf32> to vector<256x32xbf16>
    %c0_9 = arith.constant 0 : index
    %c0_10 = arith.constant 0 : index
    %14 = vector.load %arg5[%c0_9, %c0_10] : memref<32x8xbf16, #tpu.memory_space<vmem>>, vector<32x8xbf16>
    %cst_11 = arith.constant dense<0.000000e+00> : vector<256x8xf32>
    %15 = tpu.matmul %13, %14, %cst_11 {dimension_numbers = #tpu.dot_dimension_numbers<[1], [0], [0], [1], [0, 0, 1, 1], [], []>} : vector<256x32xbf16>, vector<32x8xbf16>, vector<256x8xf32> -> vector<256x8xf32>
    %16 = arith.truncf %15 : vector<256x8xf32> to vector<256x8xbf16>
    %c0_12 = arith.constant 0 : index
    %c0_13 = arith.constant 0 : index
    %17 = vector.load %arg6[%c0_12, %c0_13] : memref<32x8xbf16, #tpu.memory_space<vmem>>, vector<32x8xbf16>
    %cst_14 = arith.constant dense<0.000000e+00> : vector<256x8xf32>
    %18 = tpu.matmul %13, %17, %cst_14 {dimension_numbers = #tpu.dot_dimension_numbers<[1], [0], [0], [1], [0, 0, 1, 1], [], []>} : vector<256x32xbf16>, vector<32x8xbf16>, vector<256x8xf32> -> vector<256x8xf32>
    %c0_15 = arith.constant 0 : index
    %c0_16 = arith.constant 0 : index
    %19 = vector.load %arg7[%c0_15, %c0_16] : memref<1x8xf32, #tpu.memory_space<vmem>>, vector<1x8xf32>
    %20 = vector.broadcast %19 : vector<1x8xf32> to vector<256x8xf32>
    %21 = arith.addf %18, %20 : vector<256x8xf32>
    %cst_17 = arith.constant dense<0.000000e+00> : vector<256x8xf32>
    %22 = tpu.matmul %0, %16, %cst_17 {dimension_numbers = #tpu.dot_dimension_numbers<[1], [0], [0], [1], [0, 0, 1, 1], [], []>} : vector<256x256xbf16>, vector<256x8xbf16>, vector<256x8xf32> -> vector<256x8xf32>
    %23 = vector.broadcast %1 : vector<256x1xf32> to vector<256x8xf32>
    %24 = arith.mulf %22, %23 : vector<256x8xf32>
    %25 = arith.addf %24, %21 : vector<256x8xf32>
    %cst_18 = arith.constant 0.000000e+00 : f32
    %26 = vector.broadcast %cst_18 : f32 to vector<256x8xf32>
    %27 = arith.cmpf ogt, %25, %26 : vector<256x8xf32>
    %cst_19 = arith.constant 2.000000e-01 : f32
    %28 = vector.broadcast %cst_19 : f32 to vector<256x8xf32>
    %29 = arith.mulf %28, %25 : vector<256x8xf32>
    %30 = arith.select %27, %25, %29 : vector<256x8xi1>, vector<256x8xf32>
    %c0_20 = arith.constant 0 : index
    %c0_21 = arith.constant 0 : index
    %31 = vector.load %arg4[%c0_20, %c0_21] : memref<2x256xf32, #tpu.memory_space<vmem>>, vector<2x256xf32>
    %cst_22 = arith.constant dense<0.000000e+00> : vector<2x8xf32>
    %32 = tpu.matmul %31, %30, %cst_22 {dimension_numbers = #tpu.dot_dimension_numbers<[1], [0], [0], [1], [0, 0, 1, 1], [], []>} : vector<2x256xf32>, vector<256x8xf32>, vector<2x8xf32> -> vector<2x8xf32>
    %c0_23 = arith.constant 0 : index
    %c0_24 = arith.constant 0 : index
    %33 = vector.load %arg8[%c0_23, %c0_24] : memref<8x8xf32, #tpu.memory_space<vmem>>, vector<8x8xf32>
    %cst_25 = arith.constant dense<0.000000e+00> : vector<2x8xf32>
    %34 = tpu.matmul %32, %33, %cst_25 {dimension_numbers = #tpu.dot_dimension_numbers<[1], [0], [0], [1], [0, 0, 1, 1], [], []>} : vector<2x8xf32>, vector<8x8xf32>, vector<2x8xf32> -> vector<2x8xf32>
    %c0_26 = arith.constant 0 : index
    %c0_27 = arith.constant 0 : index
    %35 = vector.load %arg9[%c0_26, %c0_27] : memref<1x8xf32, #tpu.memory_space<vmem>>, vector<1x8xf32>
    %36 = vector.broadcast %35 : vector<1x8xf32> to vector<2x8xf32>
    %37 = arith.addf %34, %36 : vector<2x8xf32>
    %cst_28 = arith.constant 0.000000e+00 : f32
    %38 = vector.broadcast %cst_28 : f32 to vector<2x8xf32>
    %39 = arith.cmpf ogt, %37, %38 : vector<2x8xf32>
    %cst_29 = arith.constant 2.000000e-01 : f32
    %40 = vector.broadcast %cst_29 : f32 to vector<2x8xf32>
    %41 = arith.mulf %40, %37 : vector<2x8xf32>
    %42 = arith.select %39, %37, %41 : vector<2x8xi1>, vector<2x8xf32>
    %c0_30 = arith.constant 0 : index
    %c0_31 = arith.constant 0 : index
    %43 = vector.load %arg10[%c0_30, %c0_31] : memref<8x2xf32, #tpu.memory_space<vmem>>, vector<8x2xf32>
    %cst_32 = arith.constant dense<0.000000e+00> : vector<2x2xf32>
    %44 = tpu.matmul %42, %43, %cst_32 {dimension_numbers = #tpu.dot_dimension_numbers<[1], [0], [0], [1], [0, 0, 1, 1], [], []>} : vector<2x8xf32>, vector<8x2xf32>, vector<2x2xf32> -> vector<2x2xf32>
    %c0_33 = arith.constant 0 : index
    %c0_34 = arith.constant 0 : index
    %45 = vector.load %arg11[%c0_33, %c0_34] : memref<1x2xf32, #tpu.memory_space<vmem>>, vector<1x2xf32>
    %46 = vector.broadcast %45 : vector<1x2xf32> to vector<2x2xf32>
    %47 = arith.addf %44, %46 : vector<2x2xf32>
    %c0_35 = arith.constant 0 : index
    %c0_36 = arith.constant 0 : index
    %48 = vector.load %arg12[%c0_35, %c0_36] : memref<2x2xf32, #tpu.memory_space<vmem>>, vector<2x2xf32>
    tpu.vector_store %arg12[%c0_35, %c0_36], %47 {strides = array<i32>} : memref<2x2xf32, #tpu.memory_space<vmem>>, vector<2x2xf32>,
    return
  }
}

</mosaic_0001>

<bundles_post_ra>
// kernel: tpu_custom_call.1
= control target key start
LH: loop header
LB: loop body
LE: loop exit
PB: predicated region body
PF: predicated region fallthrough
CT: control target
= control target key end

     0   :  { %v2015_v2 = vmov 0   ;;  %s3042_s0 = inlined_call_operand.vmem [shape: bf16[256,256], index: 0, kind: input, shape index: {}]   ;;  %s3043_s1 = inlined_call_operand.vmem [shape: f32[256,1], index: 1, kind: input, shape index: {}]   ;;  %s3044_s2 = inlined_call_operand.vmem [shape: bf16[256,32], index: 2, kind: input, shape index: {}]   ;;  %s3045_s3 = inlined_call_operand.vmem [shape: f32[256,32], index: 3, kind: input, shape index: {}]   ;;  %s3046_s4 = inlined_call_operand.vmem [shape: f32[2,256], index: 4, kind: input, shape index: {}]   ;;  %s3047_s5 = inlined_call_operand.vmem [shape: bf16[32,8], index: 5, kind: input, shape index: {}]   ;;  %s3048_s6 = inlined_call_operand.vmem [shape: bf16[32,8], index: 6, kind: input, shape index: {}]   ;;  %s3049_s7 = inlined_call_operand.vmem [shape: f32[1,8], index: 7, kind: input, shape index: {}]   ;;  %s3050_s8 = inlined_call_operand.vmem [shape: f32[8,8], index: 8, kind: input, shape index: {}]   ;;  %s3051_s9 = inlined_call_operand.vmem [shape: f32[1,8], index: 9, kind: input, shape index: {}]   ;;  %s3052_s10 = inlined_call_operand.vmem [shape: f32[8,2], index: 10, kind: input, shape index: {}]   ;;  %s3053_s11 = inlined_call_operand.vmem [shape: f32[1,2], index: 11, kind: input, shape index: {}]   ;;  %s3054_s12 = inlined_call_operand.hbm [shape: f32[2,2], index: 12, kind: output, shape index: {}]  }
   0x1   :  { %v1964_v0 = vld [vmem:[%s3044_s2 + $0x38] sm:$0xff]  ;;  %1984 = vset.pattern.permute.xlu1 %v2015_v2  ;;  %1983 = vset.pattern.permute.xlu0 %v2015_v2  ;;  %v1963_v3 = vld [vmem:[%s3044_s2 + $0x30] sm:$0xff]  ;;  %v1962_v6 = vld [vmem:[%s3044_s2 + $0x28] sm:$0xff] }
   0x2   :  { %v1972_v1 = vld [vmem:[%s3044_s2 + $0x78] sm:$0xff]  ;;  %395 = vmatpush.bf16.msra.mxu0 %v1964_v0  ;;  %v1971_v4 = vld [vmem:[%s3044_s2 + $0x70] sm:$0xff]  ;;  %1985 = vset.pattern.permute.xlu2 %v2015_v2  ;;  %v1970_v7 = vld [vmem:[%s3044_s2 + $0x68] sm:$0xff] }
   0x3   :  { %484 = vmatpush.bf16.msra.mxu1 %v1972_v1  ;;  %v89_v5 = vld [vmem:[%s3043_s1 + $0x70] sm:$0xff]  ;;  %v87_v8 = vld [vmem:[%s3043_s1 + $0x60] sm:$0xff]  ;;  %v90_v11 = vld [vmem:[%s3043_s1 + $0x78] sm:$0xff] }
   0x4   :  { %645 = vperm.xlu1 %1984, %v89_v5   ;;  %635 = vperm.xlu0 %1983, %v87_v8   ;;  %v1961_v9 = vld [vmem:[%s3044_s2 + $0x20] sm:$0xff] }
   0x5   :  { %v1969_v10 = vld [vmem:[%s3044_s2 + $0x60] sm:$0xff] }
   0x6   :  { %396 = vmatpush.bf16.msra.mxu0 %v1963_v3 }
   0x7   :  { %485 = vmatpush.bf16.msra.mxu1 %v1971_v4 }
   0xa   :  { %397 = vmatpush.bf16.msra.mxu0 %v1962_v6 }
   0xb   :  { %486 = vmatpush.bf16.msra.mxu1 %v1970_v7 }
   0xc   :  { %17 = vsyncpa [#allocation3], 0  ;;  %v88_v12 = vld [vmem:[%s3043_s1 + $0x68] sm:$0xff]  ;;  %650 = vperm.xlu1 %1984, %v90_v11   ;;  %v1960_v13 = vld [vmem:[%s3044_s2 + $0x18] sm:$0xff]  ;;  %vm957_vm14 = vcmask 261120  }
   0xd   :  { %v1968_v14 = vld [vmem:[%s3044_s2 + $0x58] sm:$0xff]  ;;  %640 = vperm.xlu0 %1983, %v88_v12   ;;  %v91_v15 = vld [vmem:[%s3043_s1 + $0x80] sm:$0xff]  ;;  %v1959_v16 = vld [vmem:[%s3044_s2 + $0x10] sm:$0xff] }
   0xe   :  { %398 = vmatpush.bf16.msra.mxu0 %v1961_v9  ;;  %v1967_v17 = vld [vmem:[%s3044_s2 + $0x50] sm:$0xff]  ;;  %v94_v18 = vld [vmem:[%s3043_s1 + $0x98] sm:$0xff]  ;;  %655 = vperm.xlu2 %1985, %v91_v15   ;;  %v1958_v20 = vld [vmem:[%s3044_s2 + $0x8] sm:$0xff] }
   0xf   :  { %487 = vmatpush.bf16.msra.mxu1 %v1969_v10  ;;  %v93_v19 = vld [vmem:[%s3043_s1 + $0x90] sm:$0xff]  ;;  %v1966_v21 = vld [vmem:[%s3044_s2 + $0x48] sm:$0xff]  ;;  %v1957_v22 = vld [vmem:[%s3044_s2] sm:$0xff] }
  0x10   :  { %v92_v23 = vld [vmem:[%s3043_s1 + $0x88] sm:$0xff]  ;;  %v1965_v24 = vld [vmem:[%s3044_s2 + $0x40] sm:$0xff]  ;;  %v98_v34 = vld [vmem:[%s3043_s1 + $0xb8] sm:$0xff] }
  0x11   :  { %v1685_v25 = vld [vmem:[%s3042_s0] sm:$0xf]  ;;  %v1926_v26 = vld [vmem:[%s3042_s0 + $0x4] sm:$0xf0]  ;;  %v1925_v27 = vld [vmem:[%s3042_s0 + $0x4] sm:$0xf] }
  0x12   :  { %399 = vmatpush.bf16.msra.mxu0 %v1960_v13  ;;  %v1687_v28 = vld [vmem:[%s3042_s0 + $0x8] sm:$0xf0]  ;;  %v75_v29 = vld [vmem:[%s3043_s1] sm:$0xff]  ;;  %v2172_v31 = vor.u32 %v1926_v26, %v1685_v25  ;;  %v97_v35 = vld [vmem:[%s3043_s1 + $0xb0] sm:$0xff] }
  0x13   :  { %488 = vmatpush.bf16.msra.mxu1 %v1968_v14  ;;  %v96_v30 = vld [vmem:[%s3043_s1 + $0xa8] sm:$0xff]  ;;  %v2174_v32 = vor.u32 %v1925_v27, %v1687_v28  ;;  %v95_v33 = vld [vmem:[%s3043_s1 + $0xa0] sm:$0xff]  ;;  %v1693_v37 = vld [vmem:[%s3042_s0 + $0x10] sm:$0xf] }
  0x14   :  { %670 = vperm.xlu1 %1984, %v94_v18   ;;  %v76_v36 = vld [vmem:[%s3043_s1 + $0x8] sm:$0xff]  ;;  %v1928_v38 = vld [vmem:[%s3042_s0 + $0x14] sm:$0xf0]  ;;  %v1927_v39 = vld [vmem:[%s3042_s0 + $0x14] sm:$0xf] }
  0x15   :  { %665 = vperm.xlu0 %1983, %v93_v19   ;;  %v1695_v40 = vld [vmem:[%s3042_s0 + $0x18] sm:$0xf0]  ;;  %v99_v41 = vld [vmem:[%s3043_s1 + $0xc0] sm:$0xff]  ;;  %v2208_v43 = vor.u32 %v1928_v38, %v1693_v37  ;;  %v77_v45 = vld [vmem:[%s3043_s1 + $0x10] sm:$0xff] }
  0x16   :  { %400 = vmatpush.bf16.msra.mxu0 %v1959_v16  ;;  %660 = vperm.xlu2 %1985, %v92_v23   ;;  %v78_v42 = vld [vmem:[%s3043_s1 + $0x18] sm:$0xff]  ;;  %v2210_v44 = vor.u32 %v1927_v39, %v1695_v40  ;;  %v80_v46 = vld [vmem:[%s3043_s1 + $0x28] sm:$0xff]  ;;  %v79_v47 = vld [vmem:[%s3043_s1 + $0x20] sm:$0xff] }
  0x17   :  { %489 = vmatpush.bf16.msra.mxu1 %v1967_v17  ;;  %v1701_v48 = vld [vmem:[%s3042_s0 + $0x20] sm:$0xf]  ;;  %v1930_v49 = vld [vmem:[%s3042_s0 + $0x24] sm:$0xf0]  ;;  %v1929_v50 = vld [vmem:[%s3042_s0 + $0x24] sm:$0xf] }
  0x18   :  { %v1703_v51 = vld [vmem:[%s3042_s0 + $0x28] sm:$0xf0]  ;;  %v81_v52 = vld [vmem:[%s3043_s1 + $0x30] sm:$0xff]  ;;  %v2238_v53 = vor.u32 %v1930_v49, %v1701_v48  ;;  %v102_v55 = vld [vmem:[%s3043_s1 + $0xd8] sm:$0xff] }
  0x19   :  { %v2240_v54 = vor.u32 %v1929_v50, %v1703_v51  ;;  %v100_v56 = vld [vmem:[%s3043_s1 + $0xc8] sm:$0xff]  ;;  %v103_v57 = vld [vmem:[%s3043_s1 + $0xe0] sm:$0xff]  ;;  %v1709_v58 = vld [vmem:[%s3042_s0 + $0x30] sm:$0xf] }
  0x1a   :  { %401 = vmatpush.bf16.msra.mxu0 %v1958_v20  ;;  %v1932_v59 = vld [vmem:[%s3042_s0 + $0x34] sm:$0xf0]  ;;  %v1931_v60 = vld [vmem:[%s3042_s0 + $0x34] sm:$0xf]  ;;  %v1711_v61 = vld [vmem:[%s3042_s0 + $0x38] sm:$0xf0] }
  0x1b   :  { %490 = vmatpush.bf16.msra.mxu1 %v1966_v21  ;;  %v2265_v62 = vor.u32 %v1932_v59, %v1709_v58  ;;  %v2267_v63 = vor.u32 %v1931_v60, %v1711_v61  ;;  %v84_v0 = vld [vmem:[%s3043_s1 + $0x48] sm:$0xff]  ;;  %v101_v1 = vld [vmem:[%s3043_s1 + $0xd0] sm:$0xff]  ;;  %v82_v4 = vld [vmem:[%s3043_s1 + $0x38] sm:$0xff] }
  0x1c   :  { %575 = vperm.xlu1 %1984, %v75_v29   ;;  %v104_v2 = vld [vmem:[%s3043_s1 + $0xe8] sm:$0xff]  ;;  %v85_v3 = vld [vmem:[%s3043_s1 + $0x50] sm:$0xff]  ;;  %v1717_v6 = vld [vmem:[%s3042_s0 + $0x40] sm:$0xf] }
  0x1d   :  { %680 = vperm.xlu0 %1983, %v96_v30   ;;  %v105_v5 = vld [vmem:[%s3043_s1 + $0xf0] sm:$0xff]  ;;  %v1934_v7 = vld [vmem:[%s3042_s0 + $0x44] sm:$0xf0]  ;;  %v1933_v8 = vld [vmem:[%s3042_s0 + $0x44] sm:$0xf] }
  0x1e   :  { %402 = vmatpush.bf16.msra.mxu0 %v1957_v22  ;;  %675 = vperm.xlu2 %1985, %v95_v33   ;;  %v1719_v9 = vld [vmem:[%s3042_s0 + $0x48] sm:$0xf0]  ;;  %v2301_v10 = vor.u32 %v1934_v7, %v1717_v6  ;;  %v83_v12 = vld [vmem:[%s3043_s1 + $0x40] sm:$0xff]  ;;  %v86_v13 = vld [vmem:[%s3043_s1 + $0x58] sm:$0xff] }
  0x1f   :  { %491 = vmatpush.bf16.msra.mxu1 %v1965_v24  ;;  %v2303_v11 = vor.u32 %v1933_v8, %v1719_v9  ;;  %v1725_v14 = vld [vmem:[%s3042_s0 + $0x50] sm:$0xf]  ;;  %v1936_v15 = vld [vmem:[%s3042_s0 + $0x54] sm:$0xf0]  ;;  %v1935_v16 = vld [vmem:[%s3042_s0 + $0x54] sm:$0xf] }
  0x20   :  { %v1727_v17 = vld [vmem:[%s3042_s0 + $0x58] sm:$0xf0]  ;;  %v2325_v18 = vor.u32 %v1936_v15, %v1725_v14  ;;  %v1733_v20 = vld [vmem:[%s3042_s0 + $0x60] sm:$0xf]  ;;  %v1938_v21 = vld [vmem:[%s3042_s0 + $0x64] sm:$0xf0] }
  0x21   :  { %403 = vmatmul.bf16.vlgmr.msra.gmra.mxu0 %v2172_v31  ;;  %v2327_v19 = vor.u32 %v1935_v16, %v1727_v17  ;;  %v1937_v22 = vld [vmem:[%s3042_s0 + $0x64] sm:$0xf]  ;;  %v1735_v23 = vld [vmem:[%s3042_s0 + $0x68] sm:$0xf0]  ;;  %v2343_v24 = vor.u32 %v1938_v21, %v1733_v20  ;;  %v1741_v29 = vld [vmem:[%s3042_s0 + $0x70] sm:$0xf] }
  0x22   :  { %492 = vmatmul.bf16.vlgmr.msra.gmra.mxu1 %v2174_v32  ;;  %v2345_v25 = vor.u32 %v1937_v22, %v1735_v23  ;;  %v1940_v30 = vld [vmem:[%s3042_s0 + $0x74] sm:$0xf0]  ;;  %v1939_v33 = vld [vmem:[%s3042_s0 + $0x74] sm:$0xf]  ;;  %v765_v59 = vld [vmem:[%s3045_s3] sm:$0xff] }
  0x23   :  { %v106_v61 = vld [vmem:[%s3043_s1 + $0xf8] sm:$0xff]  ;;  %v1757_v6 = vld [vmem:[%s3042_s0 + $0x90] sm:$0xf]  ;;  %v1943_v8 = vld [vmem:[%s3042_s0 + $0x94] sm:$0xf] }
  0x24   :  { %690 = vperm.xlu1 %1984, %v98_v34   ;;  %v1743_v34 = vld [vmem:[%s3042_s0 + $0x78] sm:$0xf0]  ;;  %v1944_v7 = vld [vmem:[%s3042_s0 + $0x94] sm:$0xf0] }
  0x25   :  { %685 = vperm.xlu0 %1983, %v97_v35   ;;  %v2371_v37 = vor.u32 %v1939_v33, %v1743_v34  ;;  %v1759_v9 = vld [vmem:[%s3042_s0 + $0x98] sm:$0xf0]  ;;  %v2434_v16 = vor.u32 %v1944_v7, %v1757_v6 }
  0x26   :  { %580 = vperm.xlu2 %1985, %v76_v36   ;;  %v2369_v36 = vor.u32 %v1940_v30, %v1741_v29  ;;  %v2436_v17 = vor.u32 %v1943_v8, %v1759_v9 }
  0x28   :  { %3094 = vst [vmem:[#allocation13_spill] sm:$0xff] %v2436_v17 }
  0x2c   :  { %695 = vperm.xlu1 %1984, %v99_v41  }
  0x2d   :  { %590 = vperm.xlu0 %1983, %v78_v42   ;;  %v1749_v42 = vld [vmem:[%s3042_s0 + $0x80] sm:$0xf] }
  0x2e   :  { %585 = vperm.xlu2 %1985, %v77_v45   ;;  %v1942_v45 = vld [vmem:[%s3042_s0 + $0x84] sm:$0xf0] }
  0x2f   :  { %v2397_v49 = vor.u32 %v1942_v45, %v1749_v42  ;;  %v767_v45 = vld [vmem:[%s3045_s3 + $0x10] sm:$0xff] }
  0x31   :  { %408 = vmatmul.bf16.gmra.mxu0 %v2208_v43 }
  0x32   :  { %497 = vmatmul.bf16.gmra.mxu1 %v2210_v44 }
  0x34   :  { %600 = vperm.xlu1 %1984, %v80_v46   ;;  %v1941_v46 = vld [vmem:[%s3042_s0 + $0x84] sm:$0xf] }
  0x35   :  { %595 = vperm.xlu0 %1983, %v79_v47   ;;  %v1751_v47 = vld [vmem:[%s3042_s0 + $0x88] sm:$0xf0] }
  0x36   :  { %700 = vperm.xlu2 %1985, %v100_v56   ;;  %v2399_v50 = vor.u32 %v1941_v46, %v1751_v47 }
  0x3c   :  { %605 = vperm.xlu1 %1984, %v81_v52  }
  0x3d   :  { %710 = vperm.xlu0 %1983, %v102_v55  }
  0x3e   :  { %705 = vperm.xlu2 %1985, %v101_v1  }
  0x41   :  { %413 = vmatmul.bf16.gmra.mxu0 %v2238_v53 }
  0x42   :  { %502 = vmatmul.bf16.gmra.mxu1 %v2240_v54 }
  0x44   :  { %720 = vperm.xlu1 %1984, %v104_v2  }
  0x45   :  { %715 = vperm.xlu0 %1983, %v103_v57  }
  0x46   :  { %610 = vperm.xlu2 %1985, %v82_v4   ;;  %v766_v4 = vld [vmem:[%s3045_s3 + $0x8] sm:$0xff] }
  0x4c   :  { %725 = vperm.xlu1 %1984, %v105_v5  }
  0x4d   :  { %620 = vperm.xlu0 %1983, %v84_v0  }
  0x4e   :  { %615 = vperm.xlu2 %1985, %v83_v12  }
  0x51   :  { %418 = vmatmul.bf16.gmra.mxu0 %v2265_v62 }
  0x52   :  { %507 = vmatmul.bf16.gmra.mxu1 %v2267_v63 }
  0x54   :  { %630 = vperm.xlu1 %1984, %v86_v13  }
  0x55   :  { %625 = vperm.xlu0 %1983, %v85_v3  }
  0x56   :  { %730 = vperm.xlu2 %1985, %v106_v61   ;;  %v1765_v61 = vld [vmem:[%s3042_s0 + $0xa0] sm:$0xf] }
  0x61   :  { %423 = vmatmul.bf16.gmra.mxu0 %v2301_v10 }
  0x62   :  { %512 = vmatmul.bf16.gmra.mxu1 %v2303_v11 }
  0x68   :  { %v2353_v28 = vpop.permute.xlu2 %655 }
  0x70   :  { %v2377_v39 = vpop.permute.xlu2 %660 }
  0x71   :  { %428 = vmatmul.bf16.gmra.mxu0 %v2325_v18  ;;  %3089 = vst [vmem:[#allocation8_spill] sm:$0xff] %v2377_v39 }
  0x72   :  { %517 = vmatmul.bf16.gmra.mxu1 %v2327_v19 }
  0x76   :  { %v2349_v26 = vpop.permute.xlu1 %645  ;;  %v2351_v27 = vpop.permute.xlu0 %635 }
  0x77   :  { %3086 = vst [vmem:[#allocation5_spill] sm:$0xff] %v2349_v26 }
  0x78   :  { %3087 = vst [vmem:[#allocation6_spill] sm:$0xff] %v2351_v27  ;;  %v2395_v48 = vpop.permute.xlu2 %675 }
  0x7e   :  { %v2367_v35 = vpop.permute.xlu1 %650 }
  0x7f   :  { %v2373_v38 = vpop.permute.xlu0 %640 }
  0x80   :  { %3088 = vst [vmem:[#allocation7_spill] sm:$0xff] %v2373_v38  ;;  %v2411_v60 = vpop.permute.xlu2 %580 }
  0x81   :  { %433 = vmatmul.bf16.gmra.mxu0 %v2343_v24  ;;  %3093 = vst [vmem:[#allocation12_spill] sm:$0xff] %v2411_v60 }
  0x82   :  { %522 = vmatmul.bf16.gmra.mxu1 %v2345_v25 }
  0x86   :  { %v2379_v40 = vpop.permute.xlu1 %670 }
  0x87   :  { %3090 = vst [vmem:[#allocation9_spill] sm:$0xff] %v2379_v40  ;;  %v2381_v41 = vpop.permute.xlu0 %665 }
  0x88   :  { %v2440_v33 = vpop.permute.xlu2 %585 }
  0x89   :  { %3095 = vst [vmem:[#allocation14_spill] sm:$0xff] %v2440_v33 }
  0x8e   :  { %v2401_v56 = vpop.permute.xlu1 %575 }
  0x8f   :  { %3091 = vst [vmem:[#allocation10_spill] sm:$0xff] %v2401_v56  ;;  %v2405_v57 = vpop.permute.xlu0 %680 }
  0x90   :  { %3092 = vst [vmem:[#allocation11_spill] sm:$0xff] %v2405_v57 }
  0x91   :  { %438 = vmatmul.bf16.gmra.mxu0 %v2369_v36 }
  0x92   :  { %527 = vmatmul.bf16.gmra.mxu1 %v2371_v37 }
  0x96   :  { %v2444_v34 = vpop.permute.xlu1 %690 }
  0x97   :  { %v2432_v14 = vpop.permute.xlu0 %685  ;;  %3096 = vst [vmem:[#allocation15_spill] sm:$0xff] %v2444_v34 }
  0x9e   :  { %v404_v51 = vpop.f32.mrf.mxu0 }
  0x9f   :  { %v493_v52 = vpop.f32.mrf.mxu1  ;;  %v2450_v46 = vpop.permute.xlu0 %590 }
  0xa0   :  { %v494_v55 = vadd.f32 %v493_v52, %v404_v51  ;;  %3097 = vst [vmem:[#allocation16_spill] sm:$0xff] %v2450_v46 }
  0xa1   :  { %443 = vmatmul.bf16.gmra.mxu0 %v2397_v49 }
  0xa2   :  { %532 = vmatmul.bf16.gmra.mxu1 %v2399_v50  ;;  %v733_v58 = vmul.f32 %v2401_v56, %v494_v55 }
  0xa4   :  { %v797_v2 = vadd.f32 %v765_v59, %v733_v58  ;;  %v768_v58 = vld [vmem:[%s3045_s3 + $0x18] sm:$0xff] }
  0xa6   :  { %v406_v0 = vpop.f32.mrf.mxu0  ;;  %v861_v12 = vmul.f32 0.2, %v797_v2  ;;  %vm829_vm0 = vcmp.gt.f32.partialorder %v797_v2, 0.0 }
  0xa7   :  { %v495_v1 = vpop.f32.mrf.mxu1 }
  0xa8   :  { %v496_v3 = vadd.f32 %v495_v1, %v406_v0  ;;  %v893_v22 = vsel %vm829_vm0, %v797_v2, %v861_v12  ;;  %v1946_v0 = vld [vmem:[%s3042_s0 + $0xa4] sm:$0xf0]  ;;  %v1945_v1 = vld [vmem:[%s3042_s0 + $0xa4] sm:$0xf]  ;;  %v1767_v2 = vld [vmem:[%s3042_s0 + $0xa8] sm:$0xf0] }
  0xa9   :  { %v2470_v7 = vor.u32 %v1946_v0, %v1765_v61  ;;  %v2472_v8 = vor.u32 %v1945_v1, %v1767_v2  ;;  %v1773_v0 = vld [vmem:[%s3042_s0 + $0xb0] sm:$0xf]  ;;  %v1948_v1 = vld [vmem:[%s3042_s0 + $0xb4] sm:$0xf0]  ;;  %v1947_v2 = vld [vmem:[%s3042_s0 + $0xb4] sm:$0xf] }
  0xaa   :  { %v734_v5 = vmul.f32 %v2411_v60, %v496_v3 }
  0xab   :  { %3098 = vst [vmem:[#allocation17_spill] sm:$0xff] %v2472_v8 }
  0xac   :  { %v798_v13 = vadd.f32 %v766_v4, %v734_v5  ;;  %v2468_v5 = vpop.permute.xlu1 %695 }
  0xae   :  { %vm830_vm1 = vcmp.gt.f32.partialorder %v798_v13, 0.0  ;;  %v862_v15 = vmul.f32 0.2, %v798_v13  ;;  %v409_v20 = vpop.f32.mrf.mxu0 }
  0xaf   :  { %v498_v21 = vpop.f32.mrf.mxu1 }
  0xb0   :  { %v894_v23 = vsel %vm830_vm1, %v798_v13, %v862_v15  ;;  %v499_v29 = vadd.f32 %v498_v21, %v409_v20  ;;  %v2474_v21 = vpop.permute.xlu0 %595 }
  0xb1   :  { %v2438_v30 = vpack.c.bf16 %v894_v23, %v893_v22  ;;  %448 = vmatmul.bf16.gmra.mxu0 %v2434_v16  ;;  %3099 = vst [vmem:[#allocation18_spill] sm:$0xff] %v2474_v21  ;;  %v2480_v23 = vpop.permute.xlu2 %700 }
  0xb2   :  { %537 = vmatmul.bf16.gmra.mxu1 %v2436_v17  ;;  %v735_v42 = vmul.f32 %v2440_v33, %v499_v29  ;;  %3100 = vst [vmem:[#allocation19_spill] sm:$0xff] %v2480_v23 }
  0xb4   :  { %v799_v52 = vadd.f32 %v767_v45, %v735_v42  ;;  %v769_v42 = vld [vmem:[%s3045_s3 + $0x20] sm:$0xff]  ;;  %v2486_v45 = vpop.permute.xlu1 %600 }
  0xb5   :  { %3101 = vst [vmem:[#allocation20_spill] sm:$0xff] %v2486_v45 }
  0xb6   :  { %v411_v47 = vpop.f32.mrf.mxu0  ;;  %v863_v3 = vmul.f32 0.2, %v799_v52  ;;  %vm831_vm2 = vcmp.gt.f32.partialorder %v799_v52, 0.0 }
  0xb7   :  { %v500_v51 = vpop.f32.mrf.mxu1 }
  0xb8   :  { %v501_v55 = vadd.f32 %v500_v51, %v411_v47  ;;  %v895_v13 = vsel %vm831_vm2, %v799_v52, %v863_v3  ;;  %v1775_v3 = vld [vmem:[%s3042_s0 + $0xb8] sm:$0xf0] }
  0xba   :  { %v736_v59 = vmul.f32 %v2450_v46, %v501_v55 }
  0xbc   :  { %v800_v4 = vadd.f32 %v768_v58, %v736_v59  ;;  %v1974_v58 = vld [vmem:[%s3047_s5 + $0x8] sm:$0xff] }
  0xbd   :  { %v770_v59 = vld [vmem:[%s3045_s3 + $0x28] sm:$0xff]  ;;  %1012 = vmatpush.bf16.msrb.mxu0 %v1974_v58  ;;  %1977 = vmatpush.bf16.msra.mxu2 %v1974_v58 }
  0xbe   :  { %vm832_vm3 = vcmp.gt.f32.partialorder %v800_v4, 0.0  ;;  %v864_v6 = vmul.f32 0.2, %v800_v4  ;;  %v414_v9 = vpop.f32.mrf.mxu0 }
  0xbf   :  { %v503_v12 = vpop.f32.mrf.mxu1 }
  0xc0   :  { %v896_v15 = vsel %vm832_vm3, %v800_v4, %v864_v6  ;;  %v504_v20 = vadd.f32 %v503_v12, %v414_v9  ;;  %v2507_v9 = vpop.permute.xlu2 %705 }
  0xc1   :  { %v2476_v22 = vpack.c.bf16 %v896_v15, %v895_v13  ;;  %453 = vmatmul.bf16.gmra.mxu0 %v2470_v7  ;;  %3102 = vst [vmem:[#allocation21_spill] sm:$0xff] %v2507_v9  ;;  %v2509_v13 = vor.u32 %v1948_v1, %v1773_v0  ;;  %v2511_v15 = vor.u32 %v1947_v2, %v1775_v3  ;;  %v771_v0 = vld [vmem:[%s3045_s3 + $0x30] sm:$0xff] }
  0xc2   :  { %542 = vmatmul.bf16.gmra.mxu1 %v2472_v8  ;;  %v737_v29 = vmul.f32 %v2474_v21, %v504_v20 }
  0xc3   :  { %3103 = vst [vmem:[#allocation22_spill] sm:$0xff] %v2511_v15 }
  0xc4   :  { %v801_v52 = vadd.f32 %v769_v42, %v737_v29 }
  0xc6   :  { %v416_v47 = vpop.f32.mrf.mxu0  ;;  %v865_v4 = vmul.f32 0.2, %v801_v52  ;;  %vm833_vm4 = vcmp.gt.f32.partialorder %v801_v52, 0.0 }
  0xc7   :  { %v505_v51 = vpop.f32.mrf.mxu1 }
  0xc8   :  { %v506_v55 = vadd.f32 %v505_v51, %v416_v47  ;;  %v897_v42 = vsel %vm833_vm4, %v801_v52, %v865_v4  ;;  %v2525_v1 = vpop.permute.xlu2 %610 }
  0xc9   :  { %3106 = vst [vmem:[#allocation25_spill] sm:$0xff] %v2525_v1 }
  0xca   :  { %v738_v61 = vmul.f32 %v2486_v45, %v506_v55  ;;  %v2513_v55 = vpop.permute.xlu1 %605 }
  0xcb   :  { %3104 = vst [vmem:[#allocation23_spill] sm:$0xff] %v2513_v55 }
  0xcc   :  { %v802_v6 = vadd.f32 %v770_v59, %v738_v61  ;;  %v2519_v59 = vpop.permute.xlu0 %710 }
  0xcd   :  { %3105 = vst [vmem:[#allocation24_spill] sm:$0xff] %v2519_v59 }
  0xce   :  { %vm834_vm5 = vcmp.gt.f32.partialorder %v802_v6, 0.0  ;;  %v866_v12 = vmul.f32 0.2, %v802_v6  ;;  %v419_v20 = vpop.f32.mrf.mxu0 }
  0xcf   :  { %v508_v29 = vpop.f32.mrf.mxu1 }
  0xd0   :  { %v898_v47 = vsel %vm834_vm5, %v802_v6, %v866_v12  ;;  %v509_v51 = vadd.f32 %v508_v29, %v419_v20  ;;  %v772_v6 = vld [vmem:[%s3045_s3 + $0x38] sm:$0xff]  ;;  %v1781_v20 = vld [vmem:[%s3042_s0 + $0xc0] sm:$0xf]  ;;  %v1950_v29 = vld [vmem:[%s3042_s0 + $0xc4] sm:$0xf0]  ;;  %v2549_v8 = vpop.permute.xlu2 %615 }
  0xd1   :  { %v2515_v58 = vpack.c.bf16 %v898_v47, %v897_v42  ;;  %458 = vmatmul.bf16.gmra.mxu0 %v2509_v13  ;;  %v1949_v42 = vld [vmem:[%s3042_s0 + $0xc4] sm:$0xf]  ;;  %v1783_v47 = vld [vmem:[%s3042_s0 + $0xc8] sm:$0xf0]  ;;  %3109 = vst [vmem:[#allocation28_spill] sm:$0xff] %v2549_v8 }
  0xd2   :  { %547 = vmatmul.bf16.gmra.mxu1 %v2511_v15  ;;  %v739_v61 = vmul.f32 %v2513_v55, %v509_v51 }
  0xd4   :  { %v803_v3 = vadd.f32 %v771_v0, %v739_v61  ;;  %v2543_v0 = vpop.permute.xlu0 %715 }
  0xd5   :  { %3107 = vst [vmem:[#allocation26_spill] sm:$0xff] %v2543_v0 }
  0xd6   :  { %v421_v52 = vpop.f32.mrf.mxu0  ;;  %v867_v51 = vmul.f32 0.2, %v803_v3  ;;  %vm835_vm6 = vcmp.gt.f32.partialorder %v803_v3, 0.0 }
  0xd7   :  { %v510_v2 = vpop.f32.mrf.mxu1 }
  0xd8   :  { %v511_v4 = vadd.f32 %v510_v2, %v421_v52  ;;  %v2545_v2 = vor.u32 %v1950_v29, %v1781_v20  ;;  %v773_v20 = vld [vmem:[%s3045_s3 + $0x40] sm:$0xff] }
  0xda   :  { %v740_v12 = vmul.f32 %v2525_v1, %v511_v4  ;;  %v2547_v4 = vor.u32 %v1949_v42, %v1783_v47  ;;  %v899_v1 = vsel %vm835_vm6, %v803_v3, %v867_v51  ;;  %v1976_v47 = vld [vmem:[%s3048_s6 + $0x8] sm:$0xff]  ;;  %v1952_v51 = vld [vmem:[%s3042_s0 + $0xd4] sm:$0xf0] }
  0xdb   :  { %1979 = vmatpush.bf16.msra.mxu3 %v1976_v47  ;;  %1137 = vmatpush.bf16.msrb.mxu1 %v1976_v47 }
  0xdc   :  { %v804_v61 = vadd.f32 %v772_v6, %v740_v12  ;;  %3108 = vst [vmem:[#allocation27_spill] sm:$0xff] %v2547_v4  ;;  %v2555_v6 = vpop.permute.xlu1 %720  ;;  %v2561_v29 = vpop.permute.xlu0 %620 }
  0xdd   :  { %3110 = vst [vmem:[#allocation29_spill] sm:$0xff] %v2561_v29 }
  0xde   :  { %vm836_vm7 = vcmp.gt.f32.partialorder %v804_v61, 0.0  ;;  %v868_v52 = vmul.f32 0.2, %v804_v61  ;;  %v424_v45 = vpop.f32.mrf.mxu0 }
  0xdf   :  { %v513_v55 = vpop.f32.mrf.mxu1 }
  0xe0   :  { %v900_v15 = vsel %vm836_vm7, %v804_v61, %v868_v52  ;;  %v514_v21 = vadd.f32 %v513_v55, %v424_v45  ;;  %v1951_v61 = vld [vmem:[%s3042_s0 + $0xd4] sm:$0xf]  ;;  %v1791_v52 = vld [vmem:[%s3042_s0 + $0xd8] sm:$0xf0] }
  0xe1   :  { %v2551_v46 = vpack.c.bf16 %v900_v15, %v899_v1  ;;  %463 = vmatmul.bf16.gmra.mxu0 %v2545_v2  ;;  %v774_v15 = vld [vmem:[%s3045_s3 + $0x48] sm:$0xff] }
  0xe2   :  { %552 = vmatmul.bf16.gmra.mxu1 %v2547_v4  ;;  %v741_v12 = vmul.f32 %v2549_v8, %v514_v21  ;;  %v1789_v21 = vld [vmem:[%s3042_s0 + $0xd0] sm:$0xf]  ;;  %v2586_v8 = vor.u32 %v1951_v61, %v1791_v52  ;;  %v1975_v4 = vld [vmem:[%s3048_s6] sm:$0xff] }
  0xe3   :  { %1980 = vmatpush.bf16.msra.mxu3 %v1975_v4  ;;  %1138 = vmatpush.bf16.msrb.mxu1 %v1975_v4  ;;  %v1797_v4 = vld [vmem:[%s3042_s0 + $0xe0] sm:$0xf] }
  0xe4   :  { %v805_v55 = vadd.f32 %v773_v20, %v741_v12  ;;  %3112 = vst [vmem:[#allocation31_spill] sm:$0xff] %v2586_v8  ;;  %v2594_v60 = vpop.permute.xlu0 %625 }
  0xe5   :  { %3113 = vst [vmem:[#allocation32_spill] sm:$0xff] %v2594_v60 }
  0xe6   :  { %v426_v3 = vpop.f32.mrf.mxu0  ;;  %v869_v12 = vmul.f32 0.2, %v805_v55  ;;  %vm837_vm8 = vcmp.gt.f32.partialorder %v805_v55, 0.0 }
  0xe7   :  { %v515_v45 = vpop.f32.mrf.mxu1 }
  0xe8   :  { %v516_v42 = vadd.f32 %v515_v45, %v426_v3  ;;  %v2582_v3 = vpop.permute.xlu1 %725  ;;  %v901_v33 = vsel %vm837_vm8, %v805_v55, %v869_v12  ;;  %v775_v55 = vld [vmem:[%s3045_s3 + $0x50] sm:$0xff] }
  0xea   :  { %v742_v1 = vmul.f32 %v2561_v29, %v516_v42  ;;  %v2584_v42 = vor.u32 %v1952_v51, %v1789_v21  ;;  %v1973_v29 = vld [vmem:[%s3047_s5] sm:$0xff]  ;;  %s2016_s5 = smov [#allocation2]  }
  0xeb   :  { %1978 = vmatpush.bf16.msra.mxu2 %v1973_v29  ;;  %1013 = vmatpush.bf16.msrb.mxu0 %v1973_v29  ;;  %v1954_v29 = vld [vmem:[%s3042_s0 + $0xe4] sm:$0xf0]  ;;  %s1672_s6 = sshll.u32 %s2016_s5, 4  ;;  %s1673_s6 = int_to_ptr.vmem [resolvable:$true] %s1672_s6 }
  0xec   :  { %v806_v20 = vadd.f32 %v774_v15, %v742_v1  ;;  %3111 = vst [vmem:[#allocation30_spill] sm:$0xff] %v2584_v42 }
  0xee   :  { %vm838_vm9 = vcmp.gt.f32.partialorder %v806_v20, 0.0  ;;  %v870_v45 = vmul.f32 0.2, %v806_v20  ;;  %v429_v15 = vpop.f32.mrf.mxu0 }
  0xef   :  { %v518_v1 = vpop.f32.mrf.mxu1 }
  0xf0   :  { %v902_v17 = vsel %vm838_vm9, %v806_v20, %v870_v45  ;;  %v519_v47 = vadd.f32 %v518_v1, %v429_v15  ;;  %v2604_v61 = vpop.permute.xlu1 %630  ;;  %v1953_v15 = vld [vmem:[%s3042_s0 + $0xe4] sm:$0xf]  ;;  %v1799_v1 = vld [vmem:[%s3042_s0 + $0xe8] sm:$0xf0] }
  0xf1   :  { %v2596_v21 = vpack.c.bf16 %v902_v17, %v901_v33  ;;  %468 = vmatmul.bf16.gmra.mxu0 %v2584_v42  ;;  %3114 = vst [vmem:[#allocation33_spill] sm:$0xff] %v2604_v61  ;;  %v776_v17 = vld [vmem:[%s3045_s3 + $0x58] sm:$0xff] }
  0xf2   :  { %557 = vmatmul.bf16.gmra.mxu1 %v2586_v8  ;;  %v743_v51 = vmul.f32 %v2594_v60, %v519_v47 }
  0xf4   :  { %v807_v20 = vadd.f32 %v775_v55, %v743_v51 }
  0xf6   :  { %v431_v52 = vpop.f32.mrf.mxu0  ;;  %v871_v47 = vmul.f32 0.2, %v807_v20  ;;  %vm839_vm10 = vcmp.gt.f32.partialorder %v807_v20, 0.0 }
  0xf7   :  { %v520_v12 = vpop.f32.mrf.mxu1 }
  0xf8   :  { %v521_v45 = vadd.f32 %v520_v12, %v431_v52  ;;  %v2622_v52 = vor.u32 %v1954_v29, %v1797_v4  ;;  %v2624_v12 = vor.u32 %v1953_v15, %v1799_v1 }
  0xfa   :  { %v744_v33 = vmul.f32 %v2604_v61, %v521_v45  ;;  %3115 = vst [vmem:[#allocation34_spill] sm:$0xff] %v2624_v12  ;;  %v903_v61 = vsel %vm839_vm10, %v807_v20, %v871_v47  ;;  %v1955_v20 = vld [vmem:[%s3042_s0 + $0xf4] sm:$0xf]  ;;  %v1807_v47 = vld [vmem:[%s3042_s0 + $0xf8] sm:$0xf0] }
  0xfc   :  { %v808_v51 = vadd.f32 %v776_v17, %v744_v33  ;;  %v777_v33 = vld [vmem:[%s3045_s3 + $0x60] sm:$0xff] }
  0xfe   :  { %vm840_vm11 = vcmp.gt.f32.partialorder %v808_v51, 0.0  ;;  %v872_v55 = vmul.f32 0.2, %v808_v51  ;;  %v434_v45 = vpop.f32.mrf.mxu0 }
  0xff   :  { %v523_v60 = vpop.f32.mrf.mxu1 }
 0x100   :  { %v904_v8 = vsel %vm840_vm11, %v808_v51, %v872_v55  ;;  %v524_v42 = vadd.f32 %v523_v60, %v434_v45  ;;  %v778_v60 = vld [vmem:[%s3045_s3 + $0x68] sm:$0xff] }
 0x101   :  { %v2626_v56 = vpack.c.bf16 %v904_v8, %v903_v61  ;;  %473 = vmatmul.bf16.gmra.mxu0 %v2622_v52  ;;  %v1805_v61 = vld [vmem:[%s3042_s0 + $0xf0] sm:$0xf] }
 0x102   :  { %562 = vmatmul.bf16.gmra.mxu1 %v2624_v12  ;;  %v745_v17 = vmul.f32 %v2351_v27, %v524_v42  ;;  %v1956_v42 = vld [vmem:[%s3042_s0 + $0xf4] sm:$0xf0] }
 0x103   :  { %v2650_v45 = vor.u32 %v1956_v42, %v1805_v61 }
 0x104   :  { %v809_v15 = vadd.f32 %v777_v33, %v745_v17  ;;  %v2652_v17 = vor.u32 %v1955_v20, %v1807_v47 }
 0x106   :  { %v436_v4 = vpop.f32.mrf.mxu0  ;;  %v873_v51 = vmul.f32 0.2, %v809_v15  ;;  %vm841_vm12 = vcmp.gt.f32.partialorder %v809_v15, 0.0 }
 0x107   :  { %v525_v29 = vpop.f32.mrf.mxu1 }
 0x108   :  { %v526_v1 = vadd.f32 %v525_v29, %v436_v4  ;;  %v905_v27 = vsel %vm841_vm12, %v809_v15, %v873_v51 }
 0x10a   :  { %v746_v8 = vmul.f32 %v2373_v38, %v526_v1 }
 0x10c   :  { %v810_v55 = vadd.f32 %v778_v60, %v746_v8  ;;  %v779_v8 = vld [vmem:[%s3045_s3 + $0x70] sm:$0xff] }
 0x10e   :  { %vm842_vm13 = vcmp.gt.f32.partialorder %v810_v55, 0.0  ;;  %v874_v33 = vmul.f32 0.2, %v810_v55  ;;  %v439_v4 = vpop.f32.mrf.mxu0 }
 0x10f   :  { %v528_v29 = vpop.f32.mrf.mxu1 }
 0x110   :  { %v529_v1 = vadd.f32 %v528_v29, %v439_v4  ;;  %v906_v38 = vsel %vm842_vm13, %v810_v55, %v874_v33 }
 0x111   :  { %v931_v12 = vpack.c.bf16 %v906_v38, %v905_v27  ;;  %478 = vmatmul.bf16.gmra.mxu0 %v2650_v45  ;;  %v780_v27 = vld [vmem:[%s3045_s3 + $0x78] sm:$0xff] }
 0x112   :  { %567 = vmatmul.bf16.gmra.mxu1 %v2652_v17  ;;  %v747_v60 = vmul.f32 %v2349_v26, %v529_v1 }
 0x113   :  { %1889 = vmatmul.msk.bf16.vlgmr.msra.gmra.mxu2 %vm957_vm14, %v931_v12  ;;  %1913 = vmatmul.msk.bf16.vlgmr.msra.gmra.mxu3 %vm957_vm14, %v931_v12 }
 0x114   :  { %v811_v15 = vadd.f32 %v779_v8, %v747_v60  ;;  %v781_v8 = vld [vmem:[%s3045_s3 + $0x80] sm:$0xff] }
 0x116   :  { %v441_v61 = vpop.f32.mrf.mxu0  ;;  %v875_v47 = vmul.f32 0.2, %v811_v15  ;;  %vm843_vm15 = vcmp.gt.f32.partialorder %v811_v15, 0.0 }
 0x117   :  { %v530_v42 = vpop.f32.mrf.mxu1 }
 0x118   :  { %v531_v20 = vadd.f32 %v530_v42, %v441_v61  ;;  %v907_v29 = vsel %vm843_vm15, %v811_v15, %v875_v47 }
 0x11a   :  { %v748_v38 = vmul.f32 %v2367_v35, %v531_v20 }
 0x11c   :  { %v812_v51 = vadd.f32 %v780_v27, %v748_v38  ;;  %v782_v27 = vld [vmem:[%s3045_s3 + $0x88] sm:$0xff] }
 0x11e   :  { %vm844_vm0 = vcmp.gt.f32.partialorder %v812_v51, 0.0  ;;  %v876_v12 = vmul.f32 0.2, %v812_v51  ;;  %v444_v55 = vpop.f32.mrf.mxu0 }
 0x11f   :  { %v533_v33 = vpop.f32.mrf.mxu1 }
 0x120   :  { %v534_v4 = vadd.f32 %v533_v33, %v444_v55  ;;  %v908_v1 = vsel %vm844_vm0, %v812_v51, %v876_v12 }
 0x121   :  { %v932_v26 = vpack.c.bf16 %v908_v1, %v907_v29  ;;  %1883 = vmatmul.msk.bf16.vlgmr.msrb.gmra.mxu0 %vm957_vm14, %v2438_v30 }
 0x122   :  { %1907 = vmatmul.msk.bf16.vlgmr.msrb.gmra.mxu1 %vm957_vm14, %v2438_v30  ;;  %v749_v60 = vmul.f32 %v2353_v28, %v534_v4 }
 0x123   :  { %1890 = vmatmul.msk.bf16.gmra.mxu2 %vm957_vm14, %v932_v26  ;;  %1914 = vmatmul.msk.bf16.gmra.mxu3 %vm957_vm14, %v932_v26 }
 0x124   :  { %v813_v15 = vadd.f32 %v781_v8, %v749_v60  ;;  %v783_v60 = vld [vmem:[%s3045_s3 + $0x90] sm:$0xff] }
 0x126   :  { %v446_v61 = vpop.f32.mrf.mxu0  ;;  %v877_v38 = vmul.f32 0.2, %v813_v15  ;;  %vm845_vm1 = vcmp.gt.f32.partialorder %v813_v15, 0.0 }
 0x127   :  { %v535_v42 = vpop.f32.mrf.mxu1 }
 0x128   :  { %v536_v20 = vadd.f32 %v535_v42, %v446_v61  ;;  %v909_v33 = vsel %vm845_vm1, %v813_v15, %v877_v38 }
 0x12a   :  { %v750_v30 = vmul.f32 %v2377_v39, %v536_v20  ;;  %v784_v20 = vld [vmem:[%s3045_s3 + $0x98] sm:$0xff] }
 0x12c   :  { %v814_v47 = vadd.f32 %v782_v27, %v750_v30 }
 0x12e   :  { %vm846_vm2 = vcmp.gt.f32.partialorder %v814_v47, 0.0  ;;  %v878_v26 = vmul.f32 0.2, %v814_v47  ;;  %v449_v51 = vpop.f32.mrf.mxu0 }
 0x12f   :  { %v538_v12 = vpop.f32.mrf.mxu1 }
 0x130   :  { %v539_v55 = vadd.f32 %v538_v12, %v449_v51  ;;  %v910_v4 = vsel %vm846_vm2, %v814_v47, %v878_v26 }
 0x131   :  { %v933_v29 = vpack.c.bf16 %v910_v4, %v909_v33  ;;  %1884 = vmatmul.msk.bf16.gmra.mxu0 %vm957_vm14, %v2476_v22 }
 0x132   :  { %1908 = vmatmul.msk.bf16.gmra.mxu1 %vm957_vm14, %v2476_v22  ;;  %v751_v1 = vmul.f32 %v2381_v41, %v539_v55 }
 0x133   :  { %1891 = vmatmul.msk.bf16.gmra.mxu2 %vm957_vm14, %v933_v29  ;;  %1915 = vmatmul.msk.bf16.gmra.mxu3 %vm957_vm14, %v933_v29  ;;  %v785_v29 = vld [vmem:[%s3045_s3 + $0xa0] sm:$0xff] }
 0x134   :  { %v815_v42 = vadd.f32 %v783_v60, %v751_v1 }
 0x136   :  { %v451_v8 = vpop.f32.mrf.mxu0  ;;  %v879_v27 = vmul.f32 0.2, %v815_v42  ;;  %vm847_vm3 = vcmp.gt.f32.partialorder %v815_v42, 0.0 }
 0x137   :  { %v540_v61 = vpop.f32.mrf.mxu1 }
 0x138   :  { %v541_v15 = vadd.f32 %v540_v61, %v451_v8  ;;  %v911_v12 = vsel %vm847_vm3, %v815_v42, %v879_v27  ;;  %v786_v42 = vld [vmem:[%s3045_s3 + $0xa8] sm:$0xff] }
 0x13a   :  { %v752_v22 = vmul.f32 %v2379_v40, %v541_v15 }
 0x13c   :  { %v816_v30 = vadd.f32 %v784_v20, %v752_v22 }
 0x13e   :  { %vm848_vm4 = vcmp.gt.f32.partialorder %v816_v30, 0.0  ;;  %v880_v38 = vmul.f32 0.2, %v816_v30  ;;  %v454_v47 = vpop.f32.mrf.mxu0 }
 0x13f   :  { %v543_v26 = vpop.f32.mrf.mxu1 }
 0x140   :  { %v544_v51 = vadd.f32 %v543_v26, %v454_v47  ;;  %v912_v55 = vsel %vm848_vm4, %v816_v30, %v880_v38 }
 0x141   :  { %v934_v33 = vpack.c.bf16 %v912_v55, %v911_v12  ;;  %1885 = vmatmul.msk.bf16.gmra.mxu0 %vm957_vm14, %v2515_v58  ;;  %v787_v55 = vld [vmem:[%s3045_s3 + $0xb0] sm:$0xff] }
 0x142   :  { %1909 = vmatmul.msk.bf16.gmra.mxu1 %vm957_vm14, %v2515_v58  ;;  %v753_v4 = vmul.f32 %v2395_v48, %v544_v51 }
 0x143   :  { %1892 = vmatmul.msk.bf16.gmra.mxu2 %vm957_vm14, %v934_v33  ;;  %1916 = vmatmul.msk.bf16.gmra.mxu3 %vm957_vm14, %v934_v33 }
 0x144   :  { %v817_v8 = vadd.f32 %v785_v29, %v753_v4 }
 0x146   :  { %v456_v1 = vpop.f32.mrf.mxu0  ;;  %v881_v20 = vmul.f32 0.2, %v817_v8  ;;  %vm849_vm5 = vcmp.gt.f32.partialorder %v817_v8, 0.0 }
 0x147   :  { %v545_v60 = vpop.f32.mrf.mxu1 }
 0x148   :  { %v546_v61 = vadd.f32 %v545_v60, %v456_v1  ;;  %v913_v47 = vsel %vm849_vm5, %v817_v8, %v881_v20  ;;  %v788_v60 = vld [vmem:[%s3045_s3 + $0xb8] sm:$0xff] }
 0x14a   :  { %v754_v58 = vmul.f32 %v2405_v57, %v546_v61 }
 0x14c   :  { %v818_v15 = vadd.f32 %v786_v42, %v754_v58 }
 0x14e   :  { %vm850_vm6 = vcmp.gt.f32.partialorder %v818_v15, 0.0  ;;  %v882_v22 = vmul.f32 0.2, %v818_v15  ;;  %v459_v27 = vpop.f32.mrf.mxu0 }
 0x14f   :  { %v548_v30 = vpop.f32.mrf.mxu1 }
 0x150   :  { %v549_v38 = vadd.f32 %v548_v30, %v459_v27  ;;  %v914_v26 = vsel %vm850_vm6, %v818_v15, %v882_v22 }
 0x151   :  { %v935_v51 = vpack.c.bf16 %v914_v26, %v913_v47  ;;  %1886 = vmatmul.msk.bf16.gmra.mxu0 %vm957_vm14, %v2551_v46  ;;  %v789_v47 = vld [vmem:[%s3045_s3 + $0xc0] sm:$0xff] }
 0x152   :  { %1910 = vmatmul.msk.bf16.gmra.mxu1 %vm957_vm14, %v2551_v46  ;;  %v755_v12 = vmul.f32 %v2432_v14, %v549_v38 }
 0x153   :  { %1893 = vmatmul.msk.bf16.gmra.mxu2 %vm957_vm14, %v935_v51  ;;  %1917 = vmatmul.msk.bf16.gmra.mxu3 %vm957_vm14, %v935_v51 }
 0x154   :  { %v819_v29 = vadd.f32 %v787_v55, %v755_v12 }
 0x156   :  { %v461_v33 = vpop.f32.mrf.mxu0  ;;  %v883_v8 = vmul.f32 0.2, %v819_v29  ;;  %vm851_vm7 = vcmp.gt.f32.partialorder %v819_v29, 0.0 }
 0x157   :  { %v550_v4 = vpop.f32.mrf.mxu1 }
 0x158   :  { %v551_v1 = vadd.f32 %v550_v4, %v461_v33  ;;  %v915_v22 = vsel %vm851_vm7, %v819_v29, %v883_v8  ;;  %v790_v33 = vld [vmem:[%s3045_s3 + $0xc8] sm:$0xff] }
 0x15a   :  { %v756_v46 = vmul.f32 %v2444_v34, %v551_v1 }
 0x15c   :  { %v820_v61 = vadd.f32 %v788_v60, %v756_v46 }
 0x15e   :  { %v884_v42 = vmul.f32 0.2, %v820_v61  ;;  %vm852_vm8 = vcmp.gt.f32.partialorder %v820_v61, 0.0  ;;  %v464_v58 = vpop.f32.mrf.mxu0 }
 0x15f   :  { %v553_v15 = vpop.f32.mrf.mxu1 }
 0x160   :  { %v554_v20 = vadd.f32 %v553_v15, %v464_v58  ;;  %v916_v27 = vsel %vm852_vm8, %v820_v61, %v884_v42 }
 0x161   :  { %v936_v30 = vpack.c.bf16 %v916_v27, %v915_v22  ;;  %1887 = vmatmul.msk.bf16.gmra.mxu0 %vm957_vm14, %v2596_v21 }
 0x162   :  { %1911 = vmatmul.msk.bf16.gmra.mxu1 %vm957_vm14, %v2596_v21  ;;  %v757_v38 = vmul.f32 %v2468_v5, %v554_v20  ;;  %v791_v20 = vld [vmem:[%s3045_s3 + $0xd0] sm:$0xff] }
 0x163   :  { %1894 = vmatmul.msk.bf16.gmra.mxu2 %vm957_vm14, %v936_v30  ;;  %1918 = vmatmul.msk.bf16.gmra.mxu3 %vm957_vm14, %v936_v30 }
 0x164   :  { %v821_v12 = vadd.f32 %v789_v47, %v757_v38  ;;  %v792_v47 = vld [vmem:[%s3045_s3 + $0xd8] sm:$0xff] }
 0x166   :  { %v466_v26 = vpop.f32.mrf.mxu0  ;;  %v885_v4 = vmul.f32 0.2, %v821_v12  ;;  %vm853_vm9 = vcmp.gt.f32.partialorder %v821_v12, 0.0 }
 0x167   :  { %v555_v51 = vpop.f32.mrf.mxu1 }
 0x168   :  { %v556_v55 = vadd.f32 %v555_v51, %v466_v26  ;;  %v917_v61 = vsel %vm853_vm9, %v821_v12, %v885_v4 }
 0x16a   :  { %v758_v21 = vmul.f32 %v2480_v23, %v556_v55 }
 0x16c   :  { %v822_v29 = vadd.f32 %v790_v33, %v758_v21 }
 0x16e   :  { %v886_v1 = vmul.f32 0.2, %v822_v29  ;;  %vm854_vm10 = vcmp.gt.f32.partialorder %v822_v29, 0.0  ;;  %v469_v60 = vpop.f32.mrf.mxu0 }
 0x16f   :  { %v558_v46 = vpop.f32.mrf.mxu1 }
 0x170   :  { %v559_v8 = vadd.f32 %v558_v46, %v469_v60  ;;  %v918_v42 = vsel %vm854_vm10, %v822_v29, %v886_v1  ;;  %v793_v46 = vld [vmem:[%s3045_s3 + $0xe0] sm:$0xff] }
 0x171   :  { %v937_v58 = vpack.c.bf16 %v918_v42, %v917_v61  ;;  %1888 = vmatmul.msk.bf16.gmra.mxu0 %vm957_vm14, %v2626_v56 }
 0x172   :  { %1912 = vmatmul.msk.bf16.gmra.mxu1 %vm957_vm14, %v2626_v56  ;;  %v759_v15 = vmul.f32 %v2507_v9, %v559_v8 }
 0x173   :  { %1895 = vmatmul.msk.bf16.gmra.mxu2 %vm957_vm14, %v937_v58  ;;  %1919 = vmatmul.msk.bf16.gmra.mxu3 %vm957_vm14, %v937_v58 }
 0x174   :  { %v823_v30 = vadd.f32 %v791_v20, %v759_v15  ;;  %v794_v15 = vld [vmem:[%s3045_s3 + $0xe8] sm:$0xff] }
 0x176   :  { %v471_v22 = vpop.f32.mrf.mxu0  ;;  %v887_v26 = vmul.f32 0.2, %v823_v30  ;;  %vm855_vm11 = vcmp.gt.f32.partialorder %v823_v30, 0.0 }
 0x177   :  { %v560_v27 = vpop.f32.mrf.mxu1 }
 0x178   :  { %v561_v38 = vadd.f32 %v560_v27, %v471_v22  ;;  %v919_v4 = vsel %vm855_vm11, %v823_v30, %v887_v26 }
 0x17a   :  { %v760_v56 = vmul.f32 %v2519_v59, %v561_v38 }
 0x17c   :  { %v824_v51 = vadd.f32 %v792_v47, %v760_v56 }
 0x17e   :  { %v888_v12 = vmul.f32 0.2, %v824_v51  ;;  %vm856_vm12 = vcmp.gt.f32.partialorder %v824_v51, 0.0  ;;  %v474_v55 = vpop.f32.mrf.mxu0 }
 0x17f   :  { %v563_v33 = vpop.f32.mrf.mxu1 }
 0x180   :  { %v564_v21 = vadd.f32 %v563_v33, %v474_v55  ;;  %v920_v29 = vsel %vm856_vm12, %v824_v51, %v888_v12  ;;  %v795_v33 = vld [vmem:[%s3045_s3 + $0xf0] sm:$0xff] }
 0x181   :  { %v938_v1 = vpack.c.bf16 %v920_v29, %v919_v4 }
 0x182   :  { %v761_v60 = vmul.f32 %v2543_v0, %v564_v21 }
 0x183   :  { %1896 = vmatmul.msk.bf16.gmra.mxu2 %vm957_vm14, %v938_v1  ;;  %1920 = vmatmul.msk.bf16.gmra.mxu3 %vm957_vm14, %v938_v1 }
 0x184   :  { %v825_v42 = vadd.f32 %v793_v46, %v761_v60  ;;  %v2766_v46 = vpop.permute.xlu2 %730 }
 0x185   :  { %3116 = vst [vmem:[#allocation35_spill] sm:$0xff] %v2766_v46 }
 0x186   :  { %v476_v8 = vpop.f32.mrf.mxu0  ;;  %v889_v22 = vmul.f32 0.2, %v825_v42  ;;  %vm857_vm13 = vcmp.gt.f32.partialorder %v825_v42, 0.0 }
 0x187   :  { %v565_v61 = vpop.f32.mrf.mxu1 }
 0x188   :  { %v566_v58 = vadd.f32 %v565_v61, %v476_v8  ;;  %v921_v26 = vsel %vm857_vm13, %v825_v42, %v889_v22  ;;  %v796_v8 = vld [vmem:[%s3045_s3 + $0xf8] sm:$0xff] }
 0x18a   :  { %v762_v20 = vmul.f32 %v2555_v6, %v566_v58 }
 0x18c   :  { %v826_v27 = vadd.f32 %v794_v15, %v762_v20 }
 0x18e   :  { %v890_v30 = vmul.f32 0.2, %v826_v27  ;;  %vm858_vm15 = vcmp.gt.f32.partialorder %v826_v27, 0.0  ;;  %v479_v38 = vpop.f32.mrf.mxu0 }
 0x18f   :  { %v568_v47 = vpop.f32.mrf.mxu1 }
 0x190   :  { %v569_v56 = vadd.f32 %v568_v47, %v479_v38  ;;  %v922_v51 = vsel %vm858_vm15, %v826_v27, %v890_v30 }
 0x191   :  { %v939_v12 = vpack.c.bf16 %v922_v51, %v921_v26 }
 0x192   :  { %v763_v55 = vmul.f32 %v2582_v3, %v569_v56 }
 0x193   :  { %1897 = vmatmul.msk.bf16.gmra.mxu2 %vm957_vm14, %v939_v12  ;;  %1921 = vmatmul.msk.bf16.gmra.mxu3 %vm957_vm14, %v939_v12 }
 0x194   :  { %v827_v1 = vadd.f32 %v795_v33, %v763_v55 }
 0x196   :  { %v1045_v21 = vpop.f32.mrf.mxu2  ;;  %v481_v4 = vpop.f32.mrf.mxu0  ;;  %v891_v42 = vmul.f32 0.2, %v827_v1  ;;  %vm859_vm0 = vcmp.gt.f32.partialorder %v827_v1, 0.0 }
 0x197   :  { %v570_v29 = vpop.f32.mrf.mxu1  ;;  %v2774_v34 = vpop.f32.mrf.mxu3 }
 0x198   :  { %v571_v60 = vadd.f32 %v570_v29, %v481_v4  ;;  %v923_v27 = vsel %vm859_vm0, %v827_v1, %v891_v42 }
 0x19a   :  { %v764_v61 = vmul.f32 %v2766_v46, %v571_v60 }
 0x19c   :  { %v828_v58 = vadd.f32 %v796_v8, %v764_v61 }
 0x19e   :  { %v892_v15 = vmul.f32 0.2, %v828_v58  ;;  %v1047_v20 = vpop.f32.mrf.mxu2  ;;  %vm860_vm1 = vcmp.gt.f32.partialorder %v828_v58, 0.0  ;;  %v1015_v22 = vpop.f32.mrf.mxu0 }
 0x19f   :  { %v1101_v33 = vpack.c.bf16 %v1047_v20, %v1045_v21  ;;  %v2777_v59 = vpop.f32.mrf.mxu3 }
 0x1a0   :  { %v924_v30 = vsel %vm860_vm1, %v828_v58, %v892_v15 }
 0x1a1   :  { %v940_v38 = vpack.c.bf16 %v924_v30, %v923_v27 }
 0x1a3   :  { %1898 = vmatmul.msk.bf16.gmra.mxu2 %vm957_vm14, %v940_v38  ;;  %1922 = vmatmul.msk.bf16.gmra.mxu3 %vm957_vm14, %v940_v38 }
 0x1a6   :  { %v1050_v47 = vpop.f32.mrf.mxu2  ;;  %v1017_v56 = vpop.f32.mrf.mxu0 }
 0x1a7   :  { %v1095_v26 = vpack.c.bf16 %v1017_v56, %v1015_v22 }
 0x1ae   :  { %v1052_v51 = vpop.f32.mrf.mxu2  ;;  %v1020_v12 = vpop.f32.mrf.mxu0 }
 0x1af   :  { %v1102_v55 = vpack.c.bf16 %v1052_v51, %v1050_v47 }
 0x1b1   :  { %1220 = vmatpush.bf16.msrb.mxu2 %v1102_v55 }
 0x1b5   :  { %1221 = vmatpush.bf16.msrb.mxu2 %v1101_v33 }
 0x1b6   :  { %v1055_v4 = vpop.f32.mrf.mxu2  ;;  %v1022_v29 = vpop.f32.mrf.mxu0 }
 0x1b7   :  { %v1096_v60 = vpack.c.bf16 %v1022_v29, %v1020_v12 }
 0x1be   :  { %v1057_v8 = vpop.f32.mrf.mxu2  ;;  %v1025_v1 = vpop.f32.mrf.mxu0 }
 0x1c6   :  { %v1060_v61 = vpop.f32.mrf.mxu2  ;;  %v1027_v42 = vpop.f32.mrf.mxu0 }
 0x1c7   :  { %v1097_v29 = vpack.c.bf16 %v1027_v42, %v1025_v1 }
 0x1ce   :  { %v1062_v58 = vpop.f32.mrf.mxu2  ;;  %v1030_v15 = vpop.f32.mrf.mxu0 }
 0x1d6   :  { %v1065_v27 = vpop.f32.mrf.mxu2  ;;  %v1032_v30 = vpop.f32.mrf.mxu0 }
 0x1d7   :  { %v1098_v33 = vpack.c.bf16 %v1032_v30, %v1030_v15 }
 0x1de   :  { %v1067_v38 = vpop.f32.mrf.mxu2  ;;  %v1035_v39 = vpop.f32.mrf.mxu0 }
 0x1e6   :  { %v1070_v22 = vpop.f32.mrf.mxu2  ;;  %v1037_v56 = vpop.f32.mrf.mxu0 }
 0x1e7   :  { %v1099_v55 = vpack.c.bf16 %v1037_v56, %v1035_v39 }
 0x1ee   :  { %v1072_v40 = vpop.f32.mrf.mxu2  ;;  %v1040_v47 = vpop.f32.mrf.mxu0 }
 0x1f6   :  { %v1075_v51 = vpop.f32.mrf.mxu2  ;;  %v1042_v21 = vpop.f32.mrf.mxu0 }
 0x1f7   :  { %v1100_v20 = vpack.c.bf16 %v1042_v21, %v1040_v47  ;;  %v2779_v21 = vpop.f32.mrf.mxu3 }
 0x1f9   :  { %1222 = vmatpush.bf16.msrb.mxu2 %v1100_v20  ;;  %v1106_v20 = vpack.c.bf16 %v1072_v40, %v1070_v22 }
 0x1fd   :  { %1223 = vmatpush.bf16.msrb.mxu2 %v1099_v55  ;;  %v1104_v55 = vpack.c.bf16 %v1062_v58, %v1060_v61  ;;  %v2839_v61 = vld [vmem:[%s3049_s7] ss:$0 sm:$0xff] }
 0x1fe   :  { %v1077_v12 = vpop.f32.mrf.mxu2 }
 0x1ff   :  { %v2782_v15 = vpop.f32.mrf.mxu3  ;;  %v1107_v30 = vpack.c.bf16 %v1077_v12, %v1075_v51 }
 0x201   :  { %1224 = vmatpush.bf16.msrb.mxu2 %v1098_v33 }
 0x205   :  { %1225 = vmatpush.bf16.msrb.mxu2 %v1097_v29 }
 0x206   :  { %v1080_v57 = vpop.f32.mrf.mxu2 }
 0x209   :  { %1226 = vmatpush.bf16.msrb.mxu2 %v1096_v60 }
 0x20d   :  { %1227 = vmatpush.bf16.msrb.mxu2 %v1095_v26  ;;  %v2785_v26 = vpop.f32.mrf.mxu3 }
 0x20e   :  { %v1082_v23 = vpop.f32.mrf.mxu2 }
 0x210   :  { %1228 = vmatmul.bf16.vlgmr.msrb.gmra.mxu2 %v2172_v31  ;;  %v1108_v31 = vpack.c.bf16 %v1082_v23, %v1080_v57 }
 0x215   :  { %v2787_v56 = vpop.f32.mrf.mxu3 }
 0x216   :  { %v1085_v9 = vpop.f32.mrf.mxu2  ;;  %3117 = vst [vmem:[#allocation36_spill] sm:$0xff] %v2787_v56 }
 0x21d   :  { %v2790_v33 = vpop.f32.mrf.mxu3 }
 0x21e   :  { %v1087_v47 = vpop.f32.mrf.mxu2 }
 0x21f   :  { %v1109_v60 = vpack.c.bf16 %v1087_v47, %v1085_v9  ;;  %v3127_v47 = vld [vmem:[#allocation12_spill] sm:$0xff] }
 0x220   :  { %1233 = vmatmul.bf16.gmra.mxu2 %v2208_v43  ;;  %v1105_v43 = vpack.c.bf16 %v1067_v38, %v1065_v27  ;;  %v3126_v27 = vld [vmem:[#allocation10_spill] sm:$0xff] }
 0x225   :  { %v2794_v57 = vpop.f32.mrf.mxu3 }
 0x226   :  { %v1090_v39 = vpop.f32.mrf.mxu2  ;;  %3118 = vst [vmem:[#allocation37_spill] sm:$0xff] %v2794_v57 }
 0x22d   :  { %v2796_v23 = vpop.f32.mrf.mxu3 }
 0x22e   :  { %v1092_v1 = vpop.f32.mrf.mxu2 }
 0x22f   :  { %v1110_v42 = vpack.c.bf16 %v1092_v1, %v1090_v39 }
 0x230   :  { %1238 = vmatmul.bf16.gmra.mxu2 %v2238_v53  ;;  %v1103_v53 = vpack.c.bf16 %v1057_v8, %v1055_v4 }
 0x231   :  { %1309 = vmatpush.bf16.msrb.mxu3 %v1110_v42  ;;  %v3128_v42 = vld [vmem:[#allocation13_spill] sm:$0xff] }
 0x235   :  { %1310 = vmatpush.bf16.msrb.mxu3 %v1109_v60  ;;  %v3129_v60 = vld [vmem:[#allocation30_spill] sm:$0xff] }
 0x239   :  { %1311 = vmatpush.bf16.msrb.mxu3 %v1108_v31 }
 0x23d   :  { %1312 = vmatpush.bf16.msrb.mxu3 %v1107_v30 }
 0x240   :  { %1243 = vmatmul.bf16.gmra.mxu2 %v2265_v62  ;;  %v2800_v62 = vpop.f32.mrf.mxu3 }
 0x241   :  { %1313 = vmatpush.bf16.msrb.mxu3 %v1106_v20  ;;  %3119 = vst [vmem:[#allocation38_spill] sm:$0xff] %v2800_v62 }
 0x245   :  { %1314 = vmatpush.bf16.msrb.mxu3 %v1105_v43 }
 0x248   :  { %v2803_v40 = vpop.f32.mrf.mxu3 }
 0x249   :  { %1315 = vmatpush.bf16.msrb.mxu3 %v1104_v55  ;;  %v3130_v55 = vld [vmem:[#allocation14_spill] sm:$0xff] }
 0x24d   :  { %1316 = vmatpush.bf16.msrb.mxu3 %v1103_v53 }
 0x250   :  { %1317 = vmatmul.bf16.vlgmr.msrb.gmra.mxu3 %v2174_v32  ;;  %1248 = vmatmul.bf16.gmra.mxu2 %v2301_v10  ;;  %v2806_v9 = vpop.f32.mrf.mxu3 }
 0x251   :  { %3120 = vst [vmem:[#allocation39_spill] sm:$0xff] %v2806_v9  ;;  %v3138_v9 = vld [vmem:[#allocation5_spill] sm:$0xff] }
 0x258   :  { %v2810_v32 = vpop.f32.mrf.mxu3 }
 0x260   :  { %1322 = vmatmul.bf16.gmra.mxu3 %v2210_v44  ;;  %1253 = vmatmul.bf16.gmra.mxu2 %v2325_v18  ;;  %v2812_v10 = vpop.f32.mrf.mxu3 }
 0x261   :  { %3121 = vst [vmem:[#allocation40_spill] sm:$0xff] %v2812_v10 }
 0x268   :  { %v2816_v44 = vpop.f32.mrf.mxu3 }
 0x269   :  { %3122 = vst [vmem:[#allocation41_spill] sm:$0xff] %v2816_v44 }
 0x270   :  { %1327 = vmatmul.bf16.gmra.mxu3 %v2240_v54  ;;  %1258 = vmatmul.bf16.gmra.mxu2 %v2343_v24  ;;  %v2820_v54 = vpop.f32.mrf.mxu3 }
 0x271   :  { %3123 = vst [vmem:[#allocation42_spill] sm:$0xff] %v2820_v54 }
 0x280   :  { %1332 = vmatmul.bf16.gmra.mxu3 %v2267_v63  ;;  %1263 = vmatmul.bf16.gmra.mxu2 %v2369_v36  ;;  %v2822_v63 = vpop.f32.mrf.mxu3 }
 0x281   :  { %3124 = vst [vmem:[#allocation43_spill] sm:$0xff] %v2822_v63  ;;  %v3139_v63 = vld [vmem:[#allocation7_spill] sm:$0xff] }
 0x288   :  { %v2826_v36 = vpop.f32.mrf.mxu3 }
 0x290   :  { %1337 = vmatmul.bf16.gmra.mxu3 %v2303_v11  ;;  %1268 = vmatmul.bf16.gmra.mxu2 %v2397_v49  ;;  %v2829_v49 = vpop.f32.mrf.mxu3 }
 0x293   :  { %v1229_v18 = vpop.f32.mrf.mxu2 }
 0x298   :  { %v2832_v4 = vpop.f32.mrf.mxu3 }
 0x299   :  { %3125 = vst [vmem:[#allocation44_spill] sm:$0xff] %v2832_v4 }
 0x29b   :  { %v1231_v24 = vpop.f32.mrf.mxu2 }
 0x2a0   :  { %1342 = vmatmul.bf16.gmra.mxu3 %v2327_v19  ;;  %1273 = vmatmul.bf16.gmra.mxu2 %v2434_v16  ;;  %v1140_v16 = vpop.f32.mrf.mxu1 }
 0x2a3   :  { %v1234_v11 = vpop.f32.mrf.mxu2 }
 0x2ab   :  { %v1236_v19 = vpop.f32.mrf.mxu2 }
 0x2b0   :  { %1347 = vmatmul.bf16.gmra.mxu3 %v2345_v25  ;;  %1278 = vmatmul.bf16.gmra.mxu2 %v2470_v7 }
 0x2b3   :  { %v1239_v8 = vpop.f32.mrf.mxu2 }
 0x2bb   :  { %v1241_v7 = vpop.f32.mrf.mxu2 }
 0x2c0   :  { %1352 = vmatmul.bf16.gmra.mxu3 %v2371_v37  ;;  %1283 = vmatmul.bf16.gmra.mxu2 %v2509_v13  ;;  %v1142_v37 = vpop.f32.mrf.mxu1  ;;  %v1141_v13 = vadd.f32 %v2839_v61, %v1140_v16 }
 0x2c3   :  { %v1244_v12 = vpop.f32.mrf.mxu2 }
 0x2c8   :  { %v1145_v29 = vpop.f32.mrf.mxu1 }
 0x2c9   :  { %v1146_v43 = vadd.f32 %v2839_v61, %v1145_v29 }
 0x2cb   :  { %v1246_v30 = vpop.f32.mrf.mxu2 }
 0x2d0   :  { %1357 = vmatmul.bf16.gmra.mxu3 %v2399_v50  ;;  %1288 = vmatmul.bf16.gmra.mxu2 %v2545_v2  ;;  %v1143_v2 = vadd.f32 %v2839_v61, %v1142_v37 }
 0x2d3   :  { %v1318_v25 = vpop.f32.mrf.mxu3 }
 0x2d4   :  { %v1319_v58 = vadd.f32 %v1318_v25, %v1229_v18  ;;  %v1147_v18 = vpop.f32.mrf.mxu1  ;;  %v1249_v25 = vpop.f32.mrf.mxu2 }
 0x2d6   :  { %v1398_v38 = vmul.f32 %v1319_v58, %v3126_v27  ;;  %v1148_v58 = vadd.f32 %v2839_v61, %v1147_v18 }
 0x2d8   :  { %v2843_v22 = vadd.f32 %v1398_v38, %v1141_v13  ;;  %v3131_v13 = vld [vmem:[#allocation16_spill] sm:$0xff] }
 0x2da   :  { %vm1462_vm1 = vcmp.gt.f32.partialorder %v2843_v22, 0.0 }
 0x2db   :  { %v1320_v51 = vpop.f32.mrf.mxu3 }
 0x2dc   :  { %v1321_v50 = vadd.f32 %v1320_v51, %v1231_v24  ;;  %v3132_v51 = vld [vmem:[#allocation17_spill] sm:$0xff] }
 0x2de   :  { %v1399_v39 = vmul.f32 %v1321_v50, %v3127_v47 }
 0x2e0   :  { %v2847_v1 = vadd.f32 %v1399_v39, %v1143_v2  ;;  %1362 = vmatmul.bf16.gmra.mxu3 %v3128_v42  ;;  %1293 = vmatmul.bf16.gmra.mxu2 %v3129_v60  ;;  %v1251_v2 = vpop.f32.mrf.mxu2  ;;  %v3133_v39 = vld [vmem:[#allocation18_spill] sm:$0xff] }
 0x2e2   :  { %vm1463_vm0 = vcmp.gt.f32.partialorder %v2847_v1, 0.0 }
 0x2e3   :  { %v1323_v31 = vpop.f32.mrf.mxu3 }
 0x2e4   :  { %v1324_v20 = vadd.f32 %v1323_v31, %v1234_v11  ;;  %v1150_v11 = vpop.f32.mrf.mxu1 }
 0x2e5   :  { %v1151_v47 = vadd.f32 %v2839_v61, %v1150_v11 }
 0x2e6   :  { %v1400_v53 = vmul.f32 %v1324_v20, %v3130_v55 }
 0x2e8   :  { %v2853_v24 = vadd.f32 %v1400_v53, %v1146_v43  ;;  %v1254_v31 = vpop.f32.mrf.mxu2  ;;  %v3134_v43 = vld [vmem:[#allocation22_spill] sm:$0xff] }
 0x2ea   :  { %vm1464_vm15 = vcmp.gt.f32.partialorder %v2853_v24, 0.0 }
 0x2eb   :  { %v1325_v16 = vpop.f32.mrf.mxu3 }
 0x2ec   :  { %v1326_v37 = vadd.f32 %v1325_v16, %v1236_v19 }
 0x2ee   :  { %v1401_v27 = vmul.f32 %v1326_v37, %v3131_v13  ;;  %v3135_v37 = vld [vmem:[#allocation27_spill] sm:$0xff] }
 0x2f0   :  { %v2857_v38 = vadd.f32 %v1401_v27, %v1148_v58  ;;  %1367 = vmatmul.bf16.gmra.mxu3 %v3132_v51  ;;  %1298 = vmatmul.bf16.gmra.mxu2 %v2622_v52  ;;  %v1256_v52 = vpop.f32.mrf.mxu2  ;;  %v2874_v58 = vpop.f32.mrf.mxu1 }
 0x2f2   :  { %vm1465_vm13 = vcmp.gt.f32.partialorder %v2857_v38, 0.0 }
 0x2f3   :  { %v1328_v50 = vpop.f32.mrf.mxu3 }
 0x2f4   :  { %v1329_v29 = vadd.f32 %v1328_v50, %v1239_v8  ;;  %v3136_v50 = vld [vmem:[#allocation31_spill] sm:$0xff] }
 0x2f6   :  { %v1402_v42 = vmul.f32 %v1329_v29, %v3133_v39 }
 0x2f8   :  { %v2863_v60 = vadd.f32 %v1402_v42, %v1151_v47  ;;  %v1259_v16 = vpop.f32.mrf.mxu2  ;;  %v2876_v11 = vpop.f32.mrf.mxu1  ;;  %v3137_v42 = vld [vmem:[#allocation34_spill] sm:$0xff] }
 0x2fa   :  { %vm1466_vm12 = vcmp.gt.f32.partialorder %v2863_v60, 0.0 }
 0x2fb   :  { %v1330_v19 = vpop.f32.mrf.mxu3 }
 0x2fc   :  { %v2865_v20 = vadd.f32 %v1330_v19, %v1241_v7 }
 0x300   :  { %1372 = vmatmul.bf16.gmra.mxu3 %v3134_v43  ;;  %1303 = vmatmul.bf16.gmra.mxu2 %v2650_v45  ;;  %v1261_v7 = vpop.f32.mrf.mxu2 }
 0x303   :  { %v1333_v55 = vpop.f32.mrf.mxu3 }
 0x304   :  { %v2869_v53 = vadd.f32 %v1333_v55, %v1244_v12  ;;  %v2879_v12 = vpop.f32.mrf.mxu1 }
 0x308   :  { %v1264_v45 = vpop.f32.mrf.mxu2 }
 0x30b   :  { %v1335_v18 = vpop.f32.mrf.mxu3 }
 0x30c   :  { %v2871_v8 = vadd.f32 %v1335_v18, %v1246_v30  ;;  %v1160_v39 = vpop.f32.mrf.mxu1 }
 0x310   :  { %1377 = vmatmul.bf16.gmra.mxu3 %v3135_v37  ;;  %v1266_v30 = vpop.f32.mrf.mxu2 }
 0x313   :  { %v1338_v13 = vpop.f32.mrf.mxu3 }
 0x314   :  { %v1339_v27 = vadd.f32 %v1338_v13, %v1249_v25  ;;  %v1162_v55 = vpop.f32.mrf.mxu1 }
 0x318   :  { %v1269_v43 = vpop.f32.mrf.mxu2 }
 0x31b   :  { %v1340_v51 = vpop.f32.mrf.mxu3 }
 0x31c   :  { %v1165_v13 = vpop.f32.mrf.mxu1 }
 0x320   :  { %1382 = vmatmul.bf16.gmra.mxu3 %v3136_v50  ;;  %v2882_v25 = vpop.f32.mrf.mxu2 }
 0x323   :  { %v1343_v29 = vpop.f32.mrf.mxu3 }
 0x324   :  { %v1344_v4 = vadd.f32 %v1343_v29, %v1254_v31  ;;  %v3142_v31 = vld [vmem:[#allocation32_spill] sm:$0xff] }
 0x326   :  { %v1408_v29 = vmul.f32 %v1344_v4, %v3142_v31  ;;  %v1163_v4 = vadd.f32 %v2839_v61, %v1162_v55 }
 0x328   :  { %v2885_v57 = vpop.f32.mrf.mxu2 }
 0x32b   :  { %v1345_v47 = vpop.f32.mrf.mxu3 }
 0x32c   :  { %v1346_v54 = vadd.f32 %v1345_v47, %v1256_v52  ;;  %v3141_v52 = vld [vmem:[#allocation33_spill] sm:$0xff] }
 0x330   :  { %1387 = vmatmul.bf16.gmra.mxu3 %v3137_v42  ;;  %v1176_v42 = vadd.f32 %v2839_v61, %v2779_v21  ;;  %v1171_v21 = vadd.f32 %v2839_v61, %v2774_v34 }
 0x333   :  { %v1348_v19 = vpop.f32.mrf.mxu3 }
 0x334   :  { %v1349_v62 = vadd.f32 %v1348_v19, %v1259_v16 }
 0x33b   :  { %v1350_v18 = vpop.f32.mrf.mxu3 }
 0x33c   :  { %v1351_v56 = vadd.f32 %v1350_v18, %v1261_v7  ;;  %v1178_v7 = vadd.f32 %v2839_v61, %v2782_v15  ;;  %v3140_v18 = vld [vmem:[#allocation6_spill] sm:$0xff] }
 0x33d   :  { %v1410_v16 = vmul.f32 %v1349_v62, %v3140_v18  ;;  %v1166_v62 = vadd.f32 %v2839_v61, %v1165_v13 }
 0x33e   :  { %v1411_v46 = vmul.f32 %v1351_v56, %v3139_v63  ;;  %v1409_v56 = vmul.f32 %v1346_v54, %v3141_v52 }
 0x33f   :  { %v1442_v47 = vadd.f32 %v1410_v16, %v1171_v21  ;;  %v1440_v13 = vadd.f32 %v1408_v29, %v1166_v62  ;;  %v1161_v16 = vadd.f32 %v2839_v61, %v1160_v39 }
 0x340   :  { %1392 = vmatmul.bf16.gmra.mxu3 %v2652_v17  ;;  %v1173_v17 = vadd.f32 %v2839_v61, %v2777_v59 }
 0x341   :  { %v1506_v18 = vmul.f32 0.2, %v1442_v47  ;;  %vm1474_vm4 = vcmp.gt.f32.partialorder %v1442_v47, 0.0  ;;  %vm1472_vm6 = vcmp.gt.f32.partialorder %v1440_v13, 0.0 }
 0x343   :  { %v1353_v37 = vpop.f32.mrf.mxu3  ;;  %v1538_v39 = vsel %vm1474_vm4, %v1442_v47, %v1506_v18  ;;  %v1153_v47 = vadd.f32 %v2839_v61, %v2874_v58  ;;  %v1186_v58 = vadd.f32 %v2839_v61, %v2790_v33  ;;  %v1496_v33 = vmul.f32 0.2, %v2853_v24 }
 0x344   :  { %v1354_v50 = vadd.f32 %v1353_v37, %v1264_v45  ;;  %v1167_v45 = vpop.f32.mrf.mxu1  ;;  %v1341_v37 = vadd.f32 %v1340_v51, %v1251_v2  ;;  %v2904_v2 = vpop.f32.mrf.mxu2 }
 0x345   :  { %v1168_v59 = vadd.f32 %v2839_v61, %v1167_v45 }
 0x346   :  { %v1412_v10 = vmul.f32 %v1354_v50, %v3138_v9  ;;  %v1181_v50 = vadd.f32 %v2839_v61, %v2785_v26 }
 0x347   :  { %v1441_v34 = vadd.f32 %v1409_v56, %v1168_v59  ;;  %v1504_v56 = vmul.f32 0.2, %v1440_v13 }
 0x348   :  { %v1444_v19 = vadd.f32 %v1412_v10, %v1176_v42  ;;  %v3143_v10 = vld [vmem:[#allocation29_spill] sm:$0xff]  ;;  %v3144_v42 = vld [vmem:[#allocation28_spill] sm:$0xff] }
 0x349   :  { %v1505_v21 = vmul.f32 0.2, %v1441_v34  ;;  %vm1473_vm5 = vcmp.gt.f32.partialorder %v1441_v34, 0.0 }
 0x34a   :  { %vm1476_vm2 = vcmp.gt.f32.partialorder %v1444_v19, 0.0 }
 0x34b   :  { %v1355_v44 = vpop.f32.mrf.mxu3  ;;  %v1537_v29 = vsel %vm1473_vm5, %v1441_v34, %v1505_v21 }
 0x34c   :  { %v1356_v0 = vadd.f32 %v1355_v44, %v1266_v30  ;;  %v1443_v44 = vadd.f32 %v1411_v46, %v1173_v17  ;;  %v1508_v30 = vmul.f32 0.2, %v1444_v19  ;;  %v1406_v17 = vmul.f32 %v1339_v27, %v3144_v42 }
 0x34d   :  { %v1158_v27 = vadd.f32 %v2839_v61, %v2879_v12  ;;  %v1498_v42 = vmul.f32 0.2, %v2863_v60 }
 0x34e   :  { %v1413_v9 = vmul.f32 %v1356_v0, %v2367_v35  ;;  %v1407_v35 = vmul.f32 %v1341_v37, %v3143_v10  ;;  %v1507_v51 = vmul.f32 0.2, %v1443_v44  ;;  %vm1475_vm3 = vcmp.gt.f32.partialorder %v1443_v44, 0.0 }
 0x34f   :  { %v1540_v45 = vsel %vm1476_vm2, %v1444_v19, %v1508_v30  ;;  %v1438_v52 = vadd.f32 %v1406_v17, %v1161_v16 }
 0x350   :  { %v1445_v63 = vadd.f32 %v1413_v9, %v1178_v7  ;;  %v3145_v9 = vld [vmem:[#allocation25_spill] sm:$0xff]  ;;  %v1439_v37 = vadd.f32 %v1407_v35, %v1163_v4  ;;  %v1539_v55 = vsel %vm1475_vm3, %v1443_v44, %v1507_v51 }
 0x351   :  { %v1502_v62 = vmul.f32 0.2, %v1438_v52  ;;  %vm1470_vm8 = vcmp.gt.f32.partialorder %v1438_v52, 0.0 }
 0x352   :  { %vm1477_vm14 = vcmp.gt.f32.partialorder %v1445_v63, 0.0  ;;  %v1509_v15 = vmul.f32 0.2, %v1445_v63  ;;  %vm1471_vm7 = vcmp.gt.f32.partialorder %v1439_v37, 0.0 }
 0x353   :  { %v1358_v0 = vpop.f32.mrf.mxu3 }
 0x354   :  { %v1359_v54 = vadd.f32 %v1358_v0, %v1269_v43  ;;  %v1541_v46 = vsel %vm1477_vm14, %v1445_v63, %v1509_v15  ;;  %v1405_v43 = vmul.f32 %v2871_v8, %v3145_v9  ;;  %v1156_v8 = vadd.f32 %v2839_v61, %v2876_v11  ;;  %v3147_v63 = vld [vmem:[#allocation20_spill] sm:$0xff] }
 0x355   :  { %1565 = vmatpush.msra.mxu0 %v1541_v46  ;;  %v1403_v59 = vmul.f32 %v2865_v20, %v3147_v63  ;;  %v1503_v15 = vmul.f32 0.2, %v1439_v37  ;;  %v1536_v11 = vsel %vm1472_vm6, %v1440_v13, %v1504_v56  ;;  %v1495_v9 = vmul.f32 0.2, %v2847_v1 }
 0x356   :  { %v1414_v7 = vmul.f32 %v1359_v54, %v2353_v28  ;;  %v3146_v28 = vld [vmem:[#allocation23_spill] sm:$0xff]  ;;  %v1437_v44 = vadd.f32 %v1405_v43, %v1158_v27  ;;  %v1528_v43 = vsel %vm1464_vm15, %v2853_v24, %v1496_v33  ;;  %v1191_v27 = vadd.f32 %v2839_v61, %v2796_v23  ;;  %v3148_v33 = vld [vmem:[#allocation44_spill] sm:$0xff] }
 0x357   :  { %1566 = vmatpush.msra.mxu0 %v1540_v45  ;;  %v1404_v19 = vmul.f32 %v2869_v53, %v3146_v28  ;;  %v1279_v53 = vpop.f32.mrf.mxu2  ;;  %v1435_v20 = vadd.f32 %v1403_v59, %v1153_v47  ;;  %v1535_v10 = vsel %vm1471_vm7, %v1439_v37, %v1503_v15  ;;  %v1530_v45 = vsel %vm1466_vm12, %v2863_v60, %v1498_v42 }
 0x358   :  { %v2914_v26 = vadd.f32 %v1414_v7, %v1181_v50  ;;  %v1501_v35 = vmul.f32 0.2, %v1437_v44  ;;  %vm1469_vm9 = vcmp.gt.f32.partialorder %v1437_v44, 0.0  ;;  %v1494_v60 = vmul.f32 0.2, %v2843_v22 }
 0x359   :  { %1567 = vmatpush.msra.mxu0 %v1539_v55  ;;  %v1436_v30 = vadd.f32 %v1404_v19, %v1156_v8  ;;  %v1499_v51 = vmul.f32 0.2, %v1435_v20  ;;  %vm1467_vm11 = vcmp.gt.f32.partialorder %v1435_v20, 0.0  ;;  %v1527_v37 = vsel %vm1463_vm0, %v2847_v1, %v1495_v9 }
 0x35a   :  { %v1533_v46 = vsel %vm1469_vm9, %v1437_v44, %v1501_v35  ;;  %v1201_v15 = vadd.f32 %v2839_v61, %v2810_v32 }
 0x35b   :  { %v1360_v31 = vpop.f32.mrf.mxu3  ;;  %1568 = vmatpush.msra.mxu0 %v1538_v39  ;;  %v1500_v0 = vmul.f32 0.2, %v1436_v30  ;;  %vm1468_vm10 = vcmp.gt.f32.partialorder %v1436_v30, 0.0  ;;  %v1531_v7 = vsel %vm1467_vm11, %v1435_v20, %v1499_v51 }
 0x35c   :  { %v2925_v12 = vadd.f32 %v1360_v31, %v2882_v25  ;;  %v1534_v25 = vsel %vm1470_vm8, %v1438_v52, %v1502_v62 }
 0x35d   :  { %1569 = vmatpush.msra.mxu0 %v1537_v29  ;;  %v1532_v4 = vsel %vm1468_vm10, %v1436_v30, %v1500_v0 }
 0x35f   :  { %1570 = vmatpush.msra.mxu0 %v1536_v11  ;;  %v1281_v17 = vpop.f32.mrf.mxu2 }
 0x361   :  { %1571 = vmatpush.msra.mxu0 %v1535_v10 }
 0x363   :  { %v1363_v34 = vpop.f32.mrf.mxu3  ;;  %1572 = vmatpush.msra.mxu0 %v1534_v25 }
 0x364   :  { %v1364_v54 = vadd.f32 %v1363_v34, %v2885_v57  ;;  %v1497_v57 = vmul.f32 0.2, %v2857_v38 }
 0x365   :  { %1573 = vmatpush.msra.mxu0 %v1533_v46 }
 0x366   :  { %v1416_v50 = vmul.f32 %v1364_v54, %v2381_v41  ;;  %v1529_v16 = vsel %vm1465_vm13, %v2857_v38, %v1497_v57  ;;  %v1213_v57 = vadd.f32 %v2839_v61, %v2826_v36 }
 0x367   :  { %1574 = vmatpush.msra.mxu0 %v1532_v4  ;;  %v1284_v55 = vpop.f32.mrf.mxu2  ;;  %v1216_v4 = vadd.f32 %v2839_v61, %v2829_v49 }
 0x368   :  { %v2935_v13 = vadd.f32 %v1416_v50, %v1186_v58  ;;  %v1558_v50 = vld [vmem:[%s3046_s4] sm:$0xf] }
 0x369   :  { %1575 = vmatpush.msra.mxu0 %v1531_v7  ;;  %1560 = vst [vmem:[#allocation1] ss:$4 sm:$0xff] %v1558_v50 }
 0x36a   :  { %vm1480_vm15 = vcmp.gt.f32.partialorder %v2935_v13, 0.0 }
 0x36b   :  { %v1365_v41 = vpop.f32.mrf.mxu3  ;;  %1576 = vmatpush.msra.mxu0 %v1530_v45 }
 0x36c   :  { %v2943_v18 = vadd.f32 %v1365_v41, %v2904_v2  ;;  %v1526_v2 = vsel %vm1462_vm1, %v2843_v22, %v1494_v60  ;;  %v1196_v22 = vadd.f32 %v2839_v61, %v2803_v40  ;;  %v3149_v41 = vld [vmem:[#allocation26_spill] sm:$0xff]  ;;  %vm1478_vm1 = vcmp.gt.f32.partialorder %v2914_v26, 0.0 }
 0x36d   :  { %1577 = vmatpush.msra.mxu0 %v1529_v16 }
 0x36f   :  { %1578 = vmatpush.msra.mxu0 %v1528_v43  ;;  %v1286_v52 = vpop.f32.mrf.mxu2  ;;  %v3150_v43 = vld [vmem:[#allocation35_spill] sm:$0xff] }
 0x371   :  { %1579 = vmatpush.msra.mxu0 %v1527_v37  ;;  %v3151_v37 = vld [vmem:[#allocation43_spill] sm:$0xff] }
 0x372   :  { %v1211_v49 = vadd.f32 %v2839_v61, %v3151_v37 }
 0x373   :  { %v1368_v21 = vpop.f32.mrf.mxu3  ;;  %1580 = vmatpush.msra.mxu0 %v1526_v2  ;;  %v3152_v2 = vld [vmem:[#allocation24_spill] sm:$0xff] }
 0x374   :  { %v1369_v38 = vadd.f32 %v1368_v21, %v1279_v53 }
 0x376   :  { %v1418_v28 = vmul.f32 %v1369_v38, %v2395_v48 }
 0x377   :  { %v1289_v8 = vpop.f32.mrf.mxu2 }
 0x378   :  { %v2956_v24 = vadd.f32 %v1418_v28, %v1191_v27  ;;  %v3153_v27 = vld [vmem:[#allocation42_spill] sm:$0xff]  ;;  %v3154_v28 = vld [vmem:[#allocation21_spill] sm:$0xff] }
 0x379   :  { %v1208_v36 = vadd.f32 %v2839_v61, %v3153_v27 }
 0x37a   :  { %vm1482_vm12 = vcmp.gt.f32.partialorder %v2956_v24, 0.0 }
 0x37b   :  { %v1370_v19 = vpop.f32.mrf.mxu3 }
 0x37c   :  { %v2958_v39 = vadd.f32 %v1370_v19, %v1281_v17 }
 0x37f   :  { %v1291_v48 = vpop.f32.mrf.mxu2 }
 0x383   :  { %v1373_v56 = vpop.f32.mrf.mxu3 }
 0x384   :  { %v1374_v1 = vadd.f32 %v1373_v56, %v1284_v55 }
 0x386   :  { %v1420_v63 = vmul.f32 %v1374_v1, %v2432_v14 }
 0x387   :  { %v1294_v30 = vpop.f32.mrf.mxu2 }
 0x388   :  { %v2963_v59 = vadd.f32 %v1420_v63, %v1196_v22  ;;  %v1561_v63 = vld.sshfl [vmem:[#allocation1] sm:$0xff pattern:$0x73625140] }
 0x389   :  { %1581 = vmatmul.f32.vlgmr.msra.gmra.mxu0 %v1561_v63 }
 0x38a   :  { %vm1484_vm10 = vcmp.gt.f32.partialorder %v2963_v59, 0.0 }
 0x38b   :  { %v1375_v31 = vpop.f32.mrf.mxu3 }
 0x38c   :  { %v2965_v23 = vadd.f32 %v1375_v31, %v1286_v52  ;;  %v3156_v31 = vld [vmem:[#allocation19_spill] sm:$0xff] }
 0x38f   :  { %v1296_v62 = vpop.f32.mrf.mxu2 }
 0x393   :  { %v1378_v44 = vpop.f32.mrf.mxu3 }
 0x394   :  { %v1379_v29 = vadd.f32 %v1378_v44, %v1289_v8  ;;  %v3155_v8 = vld [vmem:[#allocation41_spill] sm:$0xff] }
 0x395   :  { %v1206_v22 = vadd.f32 %v2839_v61, %v3155_v8 }
 0x396   :  { %v1422_v53 = vmul.f32 %v1379_v29, %v2468_v5 }
 0x397   :  { %v1299_v20 = vpop.f32.mrf.mxu2 }
 0x398   :  { %v2970_v47 = vadd.f32 %v1422_v53, %v1201_v15  ;;  %v1605_v53 = vld [vmem:[%s3050_s8] sm:$0xff] }
 0x399   :  { %1629 = vmatpush.msrb.mxu0 %v1605_v53 }
 0x39a   :  { %vm1486_vm8 = vcmp.gt.f32.partialorder %v2970_v47, 0.0 }
 0x39b   :  { %v1380_v11 = vpop.f32.mrf.mxu3 }
 0x39c   :  { %v1381_v55 = vadd.f32 %v1380_v11, %v1291_v48 }
 0x39e   :  { %v1423_v48 = vmul.f32 %v1381_v55, %v3156_v31  ;;  %v1987_v31 = vld [vmem:[%s3051_s9] ss:$0 sm:$0xff] }
 0x39f   :  { %v1301_v35 = vpop.f32.mrf.mxu2 }
 0x3a3   :  { %v1383_v40 = vpop.f32.mrf.mxu3 }
 0x3a4   :  { %v1384_v45 = vadd.f32 %v1383_v40, %v1294_v30  ;;  %v3157_v30 = vld [vmem:[#allocation40_spill] sm:$0xff] }
 0x3a5   :  { %v1203_v11 = vadd.f32 %v2839_v61, %v3157_v30 }
 0x3a6   :  { %v1424_v19 = vmul.f32 %v1384_v45, %v3154_v28  ;;  %v1512_v28 = vmul.f32 0.2, %v2935_v13 }
 0x3a7   :  { %v1304_v0 = vpop.f32.mrf.mxu2 }
 0x3a8   :  { %v1456_v40 = vadd.f32 %v1424_v19, %v1206_v22 }
 0x3aa   :  { %vm1488_vm6 = vcmp.gt.f32.partialorder %v1456_v40, 0.0 }
 0x3ab   :  { %v1385_v14 = vpop.f32.mrf.mxu3 }
 0x3ac   :  { %v1386_v42 = vadd.f32 %v1385_v14, %v1296_v62 }
 0x3af   :  { %v1306_v58 = vpop.f32.mrf.mxu2 }
 0x3b3   :  { %v1388_v10 = vpop.f32.mrf.mxu3 }
 0x3b4   :  { %v1389_v51 = vadd.f32 %v1388_v10, %v1299_v20  ;;  %v3158_v20 = vld [vmem:[#allocation15_spill] sm:$0xff] }
 0x3b5   :  { %v1421_v10 = vmul.f32 %v2965_v23, %v3158_v20  ;;  %v3161_v23 = vld [vmem:[#allocation38_spill] sm:$0xff] }
 0x3b6   :  { %v1426_v16 = vmul.f32 %v1389_v51, %v3149_v41  ;;  %v1520_v51 = vmul.f32 0.2, %v1456_v40  ;;  %v3163_v41 = vld [vmem:[#allocation37_spill] sm:$0xff] }
 0x3b8   :  { %v1458_v52 = vadd.f32 %v1426_v16, %v1211_v49  ;;  %v1188_v16 = vadd.f32 %v2839_v61, %v3163_v41 }
 0x3ba   :  { %v1522_v14 = vmul.f32 0.2, %v1458_v52  ;;  %vm1490_vm4 = vcmp.gt.f32.partialorder %v1458_v52, 0.0 }
 0x3bb   :  { %v1390_v25 = vpop.f32.mrf.mxu3 }
 0x3bc   :  { %v1391_v46 = vadd.f32 %v1390_v25, %v1301_v35  ;;  %v1455_v35 = vadd.f32 %v1423_v48, %v1203_v11 }
 0x3be   :  { %v1427_v17 = vmul.f32 %v1391_v46, %v2555_v6  ;;  %v1425_v6 = vmul.f32 %v1386_v42, %v3152_v2  ;;  %v1554_v46 = vsel %vm1490_vm4, %v1458_v52, %v1522_v14  ;;  %vm1487_vm7 = vcmp.gt.f32.partialorder %v1455_v35, 0.0  ;;  %v3165_v2 = vld [vmem:[#allocation36_spill] sm:$0xff] }
 0x3bf   :  { %v1193_v42 = vadd.f32 %v2839_v61, %v3161_v23  ;;  %v1510_v52 = vmul.f32 0.2, %v2914_v26 }
 0x3c0   :  { %v1459_v21 = vadd.f32 %v1427_v17, %v1213_v57  ;;  %v1457_v44 = vadd.f32 %v1425_v6, %v1208_v36  ;;  %v1552_v17 = vsel %vm1488_vm6, %v1456_v40, %v1520_v51  ;;  %v3162_v57 = vld [vmem:[#allocation9_spill] sm:$0xff]  ;;  %v1183_v6 = vadd.f32 %v2839_v61, %v3165_v2 }
 0x3c1   :  { %v1417_v45 = vmul.f32 %v2943_v18, %v3162_v57 }
 0x3c2   :  { %v1523_v15 = vmul.f32 0.2, %v1459_v21  ;;  %vm1491_vm3 = vcmp.gt.f32.partialorder %v1459_v21, 0.0  ;;  %vm1489_vm5 = vcmp.gt.f32.partialorder %v1457_v44, 0.0 }
 0x3c3   :  { %v1393_v34 = vpop.f32.mrf.mxu3  ;;  %v1449_v49 = vadd.f32 %v1417_v45, %v1188_v16 }
 0x3c4   :  { %v1394_v54 = vadd.f32 %v1393_v34, %v1304_v0  ;;  %v1555_v25 = vsel %vm1491_vm3, %v1459_v21, %v1523_v15  ;;  %v1521_v0 = vmul.f32 0.2, %v1457_v44  ;;  %v3159_v34 = vld [vmem:[#allocation39_spill] sm:$0xff]  ;;  %vm1665_vm3 = vcmask 9216  }
 0x3c5   :  { %v1513_v36 = vmul.f32 0.2, %v1449_v49  ;;  %vm1481_vm13 = vcmp.gt.f32.partialorder %v1449_v49, 0.0  ;;  %v1988_v15 = vld [vmem:[%s3053_s11] ss:$0 sm:$0xff] }
 0x3c6   :  { %v1428_v32 = vmul.f32 %v1394_v54, %v2582_v3  ;;  %v1218_v3 = vadd.f32 %v2839_v61, %v3148_v33  ;;  %v1198_v54 = vadd.f32 %v2839_v61, %v3159_v34  ;;  %v1553_v50 = vsel %vm1489_vm5, %v1457_v44, %v1521_v0 }
 0x3c7   :  { %v1545_v61 = vsel %vm1481_vm13, %v1449_v49, %v1513_v36 }
 0x3c8   :  { %v1460_v9 = vadd.f32 %v1428_v32, %v1216_v4  ;;  %v3160_v32 = vld [vmem:[#allocation11_spill] sm:$0xff]  ;;  %v1519_v4 = vmul.f32 0.2, %v1455_v35 }
 0x3ca   :  { %v1524_v1 = vmul.f32 0.2, %v1460_v9  ;;  %vm1492_vm2 = vcmp.gt.f32.partialorder %v1460_v9, 0.0 }
 0x3cb   :  { %v1395_v5 = vpop.f32.mrf.mxu3 }
 0x3cc   :  { %v1396_v7 = vadd.f32 %v1395_v5, %v1306_v58  ;;  %v1556_v62 = vsel %vm1492_vm2, %v1460_v9, %v1524_v1  ;;  %v1419_v58 = vmul.f32 %v2958_v39, %v3160_v32  ;;  %v1453_v5 = vadd.f32 %v1421_v10, %v1198_v54  ;;  %v1562_v1 = vld.sshfl [vmem:[#allocation1 + $0x8] sm:$0xff pattern:$0x73625140] }
 0x3ce   :  { %v1429_v60 = vmul.f32 %v1396_v7, %v3150_v43  ;;  %v1518_v7 = vmul.f32 0.2, %v2970_v47  ;;  %v1451_v33 = vadd.f32 %v1419_v58, %v1193_v42  ;;  %v1517_v39 = vmul.f32 0.2, %v1453_v5 }
 0x3cf   :  { %vm1485_vm9 = vcmp.gt.f32.partialorder %v1453_v5, 0.0  ;;  %v1516_v43 = vmul.f32 0.2, %v2963_v59 }
 0x3d0   :  { %v1461_v38 = vadd.f32 %v1429_v60, %v1218_v3  ;;  %v1551_v3 = vsel %vm1487_vm7, %v1455_v35, %v1519_v4  ;;  %v1550_v9 = vsel %vm1486_vm8, %v2970_v47, %v1518_v7  ;;  %v3164_v60 = vld [vmem:[#allocation8_spill] sm:$0xff]  ;;  %v1549_v18 = vsel %vm1485_vm9, %v1453_v5, %v1517_v39 }
 0x3d1   :  { %v1415_v37 = vmul.f32 %v2925_v12, %v3164_v60  ;;  %v1515_v55 = vmul.f32 0.2, %v1451_v33  ;;  %vm1483_vm11 = vcmp.gt.f32.partialorder %v1451_v33, 0.0  ;;  %v1548_v21 = vsel %vm1484_vm10, %v2963_v59, %v1516_v43 }
 0x3d2   :  { %vm1493_vm14 = vcmp.gt.f32.partialorder %v1461_v38, 0.0  ;;  %v1525_v56 = vmul.f32 0.2, %v1461_v38  ;;  %v1514_v47 = vmul.f32 0.2, %v2956_v24  ;;  %v1544_v59 = vsel %vm1480_vm15, %v2935_v13, %v1512_v28  ;;  %v1637_v13 = vld [vmem:[%s3052_s10] sm:$0xff] }
 0x3d3   :  { %v1547_v27 = vsel %vm1483_vm11, %v1451_v33, %v1515_v55  ;;  %s1674_s10 = sshll.u32 %s3054_s12, 4  ;;  %s1675_s10 = int_to_ptr.hbm [resolvable:$true] %s1674_s10 }
 0x3d4   :  { %v1557_v29 = vsel %vm1493_vm14, %v1461_v38, %v1525_v56  ;;  %v1447_v38 = vadd.f32 %v1415_v37, %v1183_v6  ;;  %v1546_v12 = vsel %vm1482_vm12, %v2956_v24, %v1514_v47  ;;  %v1542_v24 = vsel %vm1478_vm1, %v2914_v26, %v1510_v52 }
 0x3d5   :  { %1585 = vmatpush.msra.mxu1 %v1557_v29  ;;  %vm1610_vm14 = vcmask 64512  }
 0x3d6   :  { %v1511_v19 = vmul.f32 0.2, %v1447_v38  ;;  %vm1479_vm0 = vcmp.gt.f32.partialorder %v1447_v38, 0.0 }
 0x3d7   :  { %1586 = vmatpush.msra.mxu1 %v1556_v62 }
 0x3d8   :  { %v1543_v56 = vsel %vm1479_vm0, %v1447_v38, %v1511_v19 }
 0x3d9   :  { %1587 = vmatpush.msra.mxu1 %v1555_v25 }
 0x3db   :  { %1588 = vmatpush.msra.mxu1 %v1554_v46 }
 0x3dd   :  { %1589 = vmatpush.msra.mxu1 %v1553_v50 }
 0x3df   :  { %1590 = vmatpush.msra.mxu1 %v1552_v17 }
 0x3e1   :  { %1591 = vmatpush.msra.mxu1 %v1551_v3 }
 0x3e3   :  { %1592 = vmatpush.msra.mxu1 %v1550_v9 }
 0x3e5   :  { %1593 = vmatpush.msra.mxu1 %v1549_v18 }
 0x3e7   :  { %1594 = vmatpush.msra.mxu1 %v1548_v21 }
 0x3e9   :  { %1595 = vmatpush.msra.mxu1 %v1547_v27 }
 0x3eb   :  { %1596 = vmatpush.msra.mxu1 %v1546_v12 }
 0x3ed   :  { %1597 = vmatpush.msra.mxu1 %v1545_v61 }
 0x3ef   :  { %1598 = vmatpush.msra.mxu1 %v1544_v59 }
 0x3f1   :  { %1599 = vmatpush.msra.mxu1 %v1543_v56 }
 0x3f3   :  { %1600 = vmatpush.msra.mxu1 %v1542_v24 }
 0x3f4   :  { %1601 = vmatmul.f32.vlgmr.msra.gmra.mxu1 %v1562_v1 }
 0x3f5   :  { %1660 = vmatpush.msrb.mxu1 %v1637_v13 }
 0x406   :  { %v1582_v8 = vpop.f32.mrf.mxu0 }
 0x471   :  { %v1602_v22 = vpop.f32.mrf.mxu1 }
 0x472   :  { %v1603_v63 = vadd.f32 %v1602_v22, %v1582_v8 }
 0x474   :  { %1923 = vmatmul.msk.f32.vlgmr.msrb.gmra.mxu0 %vm1610_vm14, %v1603_v63 }
 0x4f1   :  { %v1631_v48 = vpop.f32.mrf.mxu0 }
 0x4f2   :  { %v1632_v44 = vadd.f32 %v1987_v31, %v1631_v48 }
 0x4f4   :  { %vm1634_vm2 = vcmp.gt.f32.partialorder %v1632_v44, 0.0  ;;  %v1635_v26 = vmul.f32 0.2, %v1632_v44 }
 0x4f6   :  { %v1636_v29 = vsel %vm1634_vm2, %v1632_v44, %v1635_v26 }
 0x4f7   :  { %1924 = vmatmul.msk.f32.vlgmr.msrb.gmra.mxu1 %vm1610_vm14, %v1636_v29 }
 0x574   :  { %v1662_v53 = vpop.f32.mrf.mxu1 }
 0x575   :  { %v1663_v30 = vadd.f32 %v1988_v15, %v1662_v53 }
 0x577   :  { %1666 = vst.msk [vmem:[#allocation2] sm:$0x3] %vm1665_vm3, %v1663_v30 }
 0x578   :  { %1677 = dma.vmem_to_hbm [thread:$0]  %s1673_s6, 32, %s1675_s10, [#allocation3]  }
 0x579   :  { %2013 = dma.done.wait [#allocation3], 32  }
 0x57a   :  { %2014 = vsyncadd [#allocation3], 4294967264 }
 0x57b   :  { %1682 = vsyncpa [#allocation3], 1 }

</bundles_post_ra>
